<compile_context>
chip_gen: v7x
topology: tpu7x:2x2x1
jax: 0.10.0
libtpu: 0.0.40
codegen_flags: <defaults>
</compile_context>

<pallas_src>
import functools

import jax
import jax.numpy as jnp
from jax import lax
from jax.experimental import pallas as pl
from jax.experimental.pallas import tpu as pltpu


# ----------------------------- Pallas kernel ------------------------------


def gdc_fused_kernel(x_ref, a_ref, dinv_ref, w1_ref, b1_ref, w2_ref, b2_ref,
                     out_ref, h0_ref, h1_ref, *,
                     alpha, tm, num_k, out_channels, a_resident):
    """One Horner step (+ fused MLP/log_softmax on the last step) for one row tile.

    grid = (K, n_row_tiles), k outermost.  The sequential grid is REQUIRED:
    k carries the recurrence and every row tile of step k must finish before
    step k+1 starts (shared VMEM carry).  Do NOT mark these axes "parallel".

    x_ref    : [N_pad, F_pad]   node features, VMEM-resident (constant index map)
    a_ref    : [N_pad, N_pad]   (resident) or [tm, N_pad] (streamed) adjacency, bf16
    dinv_ref : [tm, 1]          1/deg for these rows (0 for zero-degree rows)
    w*/b*    :                  MLP weights/biases, resident
    out_ref  : [N_pad, C_pad]   resident log-softmax output (written on last k)
    h0/h1    : [N_pad, F_pad]   statically addressed ping-pong carry scratch
    """
    k = pl.program_id(0)
    i = pl.program_id(1)
    alpha_f = jnp.float32(alpha)
    c = jnp.float32(1.0 - alpha)

    row0 = pl.multiple_of(i * tm, tm)
    x_rows = x_ref[pl.ds(row0, tm), :]          # [tm, F_pad]
    d_rows = dinv_ref[...]                      # [tm, 1]

    def mlp_epilogue(rows):
        # dropout (inference mode) == identity
        h = jnp.dot(rows, w1_ref[...], preferred_element_type=jnp.float32) + b1_ref[...]
        h = jnp.maximum(h, 0.0)
        logits = jnp.dot(h, w2_ref[...], preferred_element_type=jnp.float32) + b2_ref[...]
        lane = lax.broadcasted_iota(jnp.int32, logits.shape, 1)
        logits = jnp.where(lane < out_channels, logits, jnp.float32(-1e30))
        m = jnp.max(logits, axis=1, keepdims=True)
        z = logits - m
        lse = jnp.log(jnp.sum(jnp.exp(z), axis=1, keepdims=True))
        out_ref[pl.ds(row0, tm), :] = z - lse

    if num_k == 0:
        # Degenerate K=0: S = alpha * I  ->  x_diffused = alpha * x.
        mlp_epilogue(alpha_f * x_rows)
        return

    # Initialise the Horner carry H_0 = alpha * x once, before the first matmul.
    @pl.when(jnp.logical_and(k == 0, i == 0))
    def _init():
        h0_ref[...] = alpha_f * x_ref[...]

    # A row tile.  Stored as bf16 (lossless for 0/1/2 counts); upcast the small
    # [tm, N_pad] slice so the accumulation path stays exactly f32.
    if a_resident:
        a_rows = a_ref[pl.ds(row0, tm), :]
    else:
        a_rows = a_ref[...]
    a_rows = a_rows.astype(jnp.float32)

    def horner_step(src_ref, dst_ref):
        az = jnp.dot(a_rows, src_ref[...], preferred_element_type=jnp.float32)
        # H_{k+1}[rows] = alpha*x[rows] + (1-alpha)*deg_inv[rows]*(A[rows,:] @ H_k)
        new_rows = alpha_f * x_rows + c * d_rows * az
        dst_ref[pl.ds(row0, tm), :] = new_rows

        # Fused MLP + log_softmax on the final Horner step: no x_diffused HBM
        # round trip and no second kernel launch.
        @pl.when(k == num_k - 1)
        def _last():
            mlp_epilogue(new_rows)

    # Statically addressed ping-pong (no dynamic leading-axis carry reads).
    @pl.when((k & 1) == 0)
    def _even():
        horner_step(h0_ref, h1_ref)

    @pl.when((k & 1) == 1)
    def _odd():
        horner_step(h1_ref, h0_ref)


# ------------------------------ JAX wrappers -------------------------------


def _round_up(v, m):
    return (v + m - 1) // m * m


def _vmem_capacity_bytes():
    """Physical VMEM capacity (generation-aware); conservative fallback."""
    try:
        info = pltpu.get_tpu_info()
        cap = getattr(info, "vmem_capacity_bytes", None)
        if cap:
            return int(cap)
    except Exception:
        pass
    return 64 << 20  # v7x-sized conservative default


def _propagate_vmem_bytes(N_pad, F_pad, H_pad, C_pad, tm, a_resident):
    """Rough footprint of the fused kernel (2x on pipelined blocks)."""
    f32, bf16 = 4, 2
    a_rows = N_pad if a_resident else tm
    need = 0
    need += 2 * a_rows * N_pad * bf16                 # A block(s)
    need += 2 * N_pad * F_pad * f32                   # x resident
    need += 2 * tm * 128 * f32                        # dinv tile (lane-padded)
    need += 2 * (F_pad * H_pad + H_pad * C_pad + 8 * (H_pad + C_pad)) * f32
    need += 2 * N_pad * C_pad * f32                   # resident output
    need += 2 * N_pad * F_pad * f32                   # h0 + h1 carry scratch
    need += tm * N_pad * (f32 + bf16)                 # in-kernel A-slice upcast temp
    need += 4 * tm * F_pad * f32                      # misc per-step temps
    return need


def gdc_forward(x, edge_index, num_nodes, params, *, alpha=0.05, K=10):
    """Full GDCModel.forward (inference mode, diffusion_type='ppr')."""
    N = int(num_nodes)
    F_in = x.shape[1]
    Hd = params["w1"].shape[0]
    C = params["w2"].shape[0]

    # Padding: node dim to a multiple of 128 (lane-dense / bf16-clean A tiles),
    # feature dims to 128 (MXU-friendly, lane-dense stores).
    N_pad = _round_up(max(N, 1), 128)
    F_pad = _round_up(max(F_in, 1), 128)
    H_pad = _round_up(max(Hd, 1), 128)
    C_pad = _round_up(max(C, 1), 128)

    # Row tile: keep the in-kernel f32 upcast of an A row slice (~tm*N_pad*4 B)
    # modest, and make tm divide N_pad.
    tm = 256
    while tm > 8 and tm * N_pad * 4 > (8 << 20):
        tm //= 2
    tm = min(tm, N_pad)
    while N_pad % tm:
        tm //= 2
    n_tiles = N_pad // tm

    # --- glue: dense adjacency with self loops (duplicate edges sum, matching
    #     torch.sparse semantics).
    # TODO(synk): for very large graphs, build A with a Pallas gather/scatter
    #             kernel instead of an XLA dense scatter-add.
    self_loops = jnp.stack([jnp.arange(N), jnp.arange(N)], axis=0)
    ei = jnp.concatenate([edge_index.astype(jnp.int32), self_loops.astype(jnp.int32)],
                         axis=1)
    A = jnp.zeros((N_pad, N_pad), jnp.float32).at[ei[0], ei[1]].add(1.0)

    deg = jnp.sum(A, axis=1, keepdims=True)
    dinv = jnp.where(deg > 0.0, 1.0 / deg, 0.0).astype(jnp.float32)

    # A's entries are small exact integers -> bf16 cast is lossless; halves the
    # HBM stream when streamed and the VMEM footprint when resident.
    # TODO(synk): fp8 storage of A on v7x for another ~2x of the A stream.
    A_bf16 = A.astype(jnp.bfloat16)

    xp = jnp.zeros((N_pad, F_pad), jnp.float32).at[:N, :F_in].set(x.astype(jnp.float32))
    w1p = jnp.zeros((F_pad, H_pad), jnp.float32).at[:F_in, :Hd].set(
        params["w1"].T.astype(jnp.float32))
    b1p = jnp.zeros((1, H_pad), jnp.float32).at[0, :Hd].set(
        params["b1"].astype(jnp.float32))
    w2p = jnp.zeros((H_pad, C_pad), jnp.float32).at[:Hd, :C].set(
        params["w2"].T.astype(jnp.float32))
    b2p = jnp.zeros((1, C_pad), jnp.float32).at[0, :C].set(
        params["b2"].astype(jnp.float32))

    # Generation-aware VMEM budget + A-residency gate.
    cap = _vmem_capacity_bytes()
    usable = int(cap * 0.8)
    resident_need = _propagate_vmem_bytes(N_pad, F_pad, H_pad, C_pad, tm, True)
    a_resident = resident_need <= usable
    need = resident_need if a_resident else _propagate_vmem_bytes(
        N_pad, F_pad, H_pad, C_pad, tm, False)
    vmem_limit = int(min(max(need + (8 << 20), 32 << 20), usable))

    if a_resident:
        a_spec = pl.BlockSpec((N_pad, N_pad), lambda k, i: (0, 0))   # VMEM-resident A
    else:
        a_spec = pl.BlockSpec((tm, N_pad), lambda k, i: (i, 0))      # streamed row tile

    out_padded = pl.pallas_call(
        functools.partial(gdc_fused_kernel, alpha=float(alpha), tm=tm,
                          num_k=int(K), out_channels=C, a_resident=a_resident),
        grid=(max(int(K), 1), n_tiles),
        in_specs=[
            pl.BlockSpec((N_pad, F_pad), lambda k, i: (0, 0)),   # x (resident)
            a_spec,                                              # A (bf16)
            pl.BlockSpec((tm, 1), lambda k, i: (i, 0)),          # deg_inv rows
            pl.BlockSpec((F_pad, H_pad), lambda k, i: (0, 0)),   # W1 (resident)
            pl.BlockSpec((1, H_pad), lambda k, i: (0, 0)),       # b1
            pl.BlockSpec((H_pad, C_pad), lambda k, i: (0, 0)),   # W2
            pl.BlockSpec((1, C_pad), lambda k, i: (0, 0)),       # b2
        ],
        # Resident accumulator output: written by the last Horner step only and
        # copied back to HBM once at the end of the grid (no K-fold writeback).
        out_specs=pl.BlockSpec((N_pad, C_pad), lambda k, i: (0, 0)),
        out_shape=jax.ShapeDtypeStruct((N_pad, C_pad), jnp.float32),
        scratch_shapes=[pltpu.VMEM((N_pad, F_pad), jnp.float32),
                        pltpu.VMEM((N_pad, F_pad), jnp.float32)],
        compiler_params=pltpu.CompilerParams(
            # Sequential grid required (shared-scratch carry across k and i).
            # TODO(synk): v7x 2-TC split of the row axis (core_map + shared carry)
            #             once A-resident/MXU-bound; plain "parallel" would be wrong.
            dimension_semantics=("arbitrary", "arbitrary"),
            vmem_limit_bytes=vmem_limit,
        ),
    )(xp, A_bf16, dinv, w1p, b1p, w2p, b2p)

    return out_padded[:N, :C]


def init_params(key, in_channels, hidden_channels, out_channels):
    """Deterministic PyTorch-Linear-style uniform init (weights stored [out, in])."""
    k1, k2, k3, k4 = jax.random.split(key, 4)
    bound1 = 1.0 / jnp.sqrt(in_channels)
    bound2 = 1.0 / jnp.sqrt(hidden_channels)
    return {
        "w1": jax.random.uniform(k1, (hidden_channels, in_channels),
                                 minval=-bound1, maxval=bound1, dtype=jnp.float32),
        "b1": jax.random.uniform(k2, (hidden_channels,),
                                 minval=-bound1, maxval=bound1, dtype=jnp.float32),
        "w2": jax.random.uniform(k3, (out_channels, hidden_channels),
                                 minval=-bound2, maxval=bound2, dtype=jnp.float32),
        "b2": jax.random.uniform(k4, (out_channels,),
                                 minval=-bound2, maxval=bound2, dtype=jnp.float32),
    }


def _reference_forward(x, edge_index, num_nodes, params, *, alpha=0.05, K=10):
    """Pure-JAX reference matching the PyTorch module (inference mode)."""
    N = int(num_nodes)
    hp = jax.lax.Precision.HIGHEST
    self_loops = jnp.stack([jnp.arange(N), jnp.arange(N)], axis=0)
    ei = jnp.concatenate([edge_index.astype(jnp.int32), self_loops.astype(jnp.int32)],
                         axis=1)
    A = jnp.zeros((N, N), jnp.float32).at[ei[0], ei[1]].add(1.0)
    deg = A.sum(axis=1)
    dinv = jnp.where(deg > 0.0, 1.0 / deg, 0.0)
    P = dinv[:, None] * A
    S = alpha * jnp.eye(N, dtype=jnp.float32)
    Pk = jnp.eye(N, dtype=jnp.float32)
    for k in range(1, K + 1):
        Pk = jnp.matmul(Pk, P, precision=hp)
        S = S + alpha * (1.0 - alpha) ** k * Pk
    xd = jnp.matmul(S, x.astype(jnp.float32), precision=hp)
    h = jax.nn.relu(jnp.matmul(xd, params["w1"].T, precision=hp) + params["b1"])
    logits = jnp.matmul(h, params["w2"].T, precision=hp) + params["b2"]
    return jax.nn.log_softmax(logits, axis=1)


# ---------------------------------- main -----------------------------------

if __name__ == "__main__":
    key = jax.random.PRNGKey(0)
    k_x, k_p = jax.random.split(key)

    num_nodes = 8
    in_channels = 16
    hidden_channels = 32
    out_channels = 4

    # node features
    x = jax.random.normal(k_x, (num_nodes, in_channels), dtype=jnp.float32)

    # simple bidirectional ring graph (no self-loops; forward adds them)
    src = jnp.arange(num_nodes)
    dst = (src + 1) % num_nodes
    edge_index = jnp.concatenate(
        [jnp.stack([src, dst], axis=0), jnp.stack([dst, src], axis=0)], axis=1
    ).astype(jnp.int32)

    params = init_params(k_p, in_channels, hidden_channels, out_channels)

    out = gdc_forward(x, edge_index, num_nodes, params, alpha=0.05, K=10)
    out = jax.block_until_ready(out)

    assert out.shape == (num_nodes, out_channels)
    # rows of log_softmax must exp-sum to 1
    assert bool(jnp.all(jnp.abs(jnp.sum(jnp.exp(out), axis=1) - 1.0) < 1e-4))

    # compare against the pure-JAX reference of the PyTorch forward
    ref = _reference_forward(x, edge_index, num_nodes, params, alpha=0.05, K=10)
    assert bool(jnp.all(jnp.abs(out - ref) < 5e-3)), "mismatch vs reference"

    print("KERNEL_OK")
</pallas_src>

<mosaic_0001>
module attributes {stable_mosaic.version = 11 : i64} {
  func.func @gdc_fused_kernel(%arg0: i32, %arg1: i32, %arg2: memref<128x128xf32, #tpu.memory_space<vmem>>, %arg3: memref<128x128xbf16, #tpu.memory_space<vmem>>, %arg4: memref<128x1xf32, #tpu.memory_space<vmem>>, %arg5: memref<128x128xf32, #tpu.memory_space<vmem>>, %arg6: memref<1x128xf32, #tpu.memory_space<vmem>>, %arg7: memref<128x128xf32, #tpu.memory_space<vmem>>, %arg8: memref<1x128xf32, #tpu.memory_space<vmem>>, %arg9: memref<128x128xf32, #tpu.memory_space<vmem>>, %arg10: memref<128x128xf32, #tpu.memory_space<vmem>>, %arg11: memref<128x128xf32, #tpu.memory_space<vmem>>) attributes {dimension_semantics = [#tpu.dimension_semantics<arbitrary>, #tpu.dimension_semantics<arbitrary>], iteration_bounds = array<i64: 10, 1>, scalar_prefetch = 0 : i64, scratch_operands = 2 : i64, tpu.core_type = #tpu.core_type<tc>, window_params = [{pipeline_mode = #tpu.pipeline_mode<synchronous>, transform_indices = @transform_0, window_bounds = array<i64: 128, 128>}, {pipeline_mode = #tpu.pipeline_mode<synchronous>, transform_indices = @transform_1, window_bounds = array<i64: 128, 128>}, {transform_indices = @transform_2, window_bounds = array<i64: 128, 1>}, {pipeline_mode = #tpu.pipeline_mode<synchronous>, transform_indices = @transform_3, window_bounds = array<i64: 128, 128>}, {pipeline_mode = #tpu.pipeline_mode<synchronous>, transform_indices = @transform_4, window_bounds = array<i64: 1, 128>}, {pipeline_mode = #tpu.pipeline_mode<synchronous>, transform_indices = @transform_5, window_bounds = array<i64: 128, 128>}, {pipeline_mode = #tpu.pipeline_mode<synchronous>, transform_indices = @transform_6, window_bounds = array<i64: 1, 128>}, {pipeline_mode = #tpu.pipeline_mode<synchronous>, transform_indices = @transform_7, window_bounds = array<i64: 128, 128>}]} {
    %c128_i32 = arith.constant 128 : i32
    %0 = arith.muli %arg1, %c128_i32 : i32
    %1 = tpu.assume_multiple %0, 128 : i32
    %2 = arith.index_cast %1 : i32 to index
    %c0 = arith.constant 0 : index
    %3 = vector.load %arg2[%2, %c0] : memref<128x128xf32, #tpu.memory_space<vmem>>, vector<128x128xf32>
    %c0_0 = arith.constant 0 : index
    %c0_1 = arith.constant 0 : index
    %4 = vector.load %arg4[%c0_0, %c0_1] : memref<128x1xf32, #tpu.memory_space<vmem>>, vector<128x1xf32>
    %c0_i32 = arith.constant 0 : i32
    %5 = arith.cmpi eq, %arg0, %c0_i32 : i32
    %c0_i32_2 = arith.constant 0 : i32
    %6 = arith.cmpi eq, %arg1, %c0_i32_2 : i32
    %7 = arith.andi %5, %6 : i1
    %8 = arith.extui %7 : i1 to i32
    %cst = arith.constant 5.000000e-02 : f32
    %c0_i32_3 = arith.constant 0 : i32
    %9 = arith.cmpi ne, %8, %c0_i32_3 : i32
    scf.if %9 {
      %c0_14 = arith.constant 0 : index
      %c0_15 = arith.constant 0 : index
      %21 = vector.load %arg2[%c0_14, %c0_15] : memref<128x128xf32, #tpu.memory_space<vmem>>, vector<128x128xf32>
      %22 = vector.broadcast %cst : f32 to vector<128x128xf32>
      %23 = arith.mulf %22, %21 : vector<128x128xf32>
      %c0_16 = arith.constant 0 : index
      %c0_17 = arith.constant 0 : index
      %24 = vector.load %arg10[%c0_16, %c0_17] : memref<128x128xf32, #tpu.memory_space<vmem>>, vector<128x128xf32>
      tpu.vector_store %arg10[%c0_16, %c0_17], %23 {strides = array<i32>} : memref<128x128xf32, #tpu.memory_space<vmem>>, vector<128x128xf32>,
    } else {
    }
    %10 = arith.index_cast %1 : i32 to index
    %c0_4 = arith.constant 0 : index
    %11 = vector.load %arg3[%10, %c0_4] : memref<128x128xbf16, #tpu.memory_space<vmem>>, vector<128x128xbf16>
    %12 = arith.extf %11 : vector<128x128xbf16> to vector<128x128xf32>
    %c1_i32 = arith.constant 1 : i32
    %13 = arith.andi %arg0, %c1_i32 : i32
    %c0_i32_5 = arith.constant 0 : i32
    %14 = arith.cmpi eq, %13, %c0_i32_5 : i32
    %15 = arith.extui %14 : i1 to i32
    %cst_6 = arith.constant 5.000000e-02 : f32
    %cst_7 = arith.constant 0.949999988 : f32
    %c0_i32_8 = arith.constant 0 : i32
    %16 = arith.cmpi ne, %15, %c0_i32_8 : i32
    scf.if %16 {
      %c0_14 = arith.constant 0 : index
      %c0_15 = arith.constant 0 : index
      %21 = vector.load %arg10[%c0_14, %c0_15] : memref<128x128xf32, #tpu.memory_space<vmem>>, vector<128x128xf32>
      %cst_16 = arith.constant dense<0.000000e+00> : vector<128x128xf32>
      %22 = tpu.matmul %12, %21, %cst_16 {dimension_numbers = #tpu.dot_dimension_numbers<[1], [0], [0], [1], [0, 0, 1, 1], [], []>} : vector<128x128xf32>, vector<128x128xf32>, vector<128x128xf32> -> vector<128x128xf32>
      %23 = vector.broadcast %cst_6 : f32 to vector<128x128xf32>
      %24 = arith.mulf %23, %3 : vector<128x128xf32>
      %25 = vector.broadcast %cst_7 : f32 to vector<128x1xf32>
      %26 = arith.mulf %25, %4 : vector<128x1xf32>
      %27 = vector.broadcast %26 : vector<128x1xf32> to vector<128x128xf32>
      %28 = arith.mulf %27, %22 : vector<128x128xf32>
      %29 = arith.addf %24, %28 : vector<128x128xf32>
      %30 = arith.index_cast %1 : i32 to index
      %c0_17 = arith.constant 0 : index
      %31 = vector.load %arg11[%30, %c0_17] : memref<128x128xf32, #tpu.memory_space<vmem>>, vector<128x128xf32>
      tpu.vector_store %arg11[%30, %c0_17], %29 {strides = array<i32>} : memref<128x128xf32, #tpu.memory_space<vmem>>, vector<128x128xf32>,
      %c9_i32 = arith.constant 9 : i32
      %32 = arith.cmpi eq, %arg0, %c9_i32 : i32
      %33 = arith.extui %32 : i1 to i32
      %c0_i32_18 = arith.constant 0 : i32
      %34 = arith.cmpi ne, %33, %c0_i32_18 : i32
      scf.if %34 {
        %c0_19 = arith.constant 0 : index
        %c0_20 = arith.constant 0 : index
        %35 = vector.load %arg5[%c0_19, %c0_20] : memref<128x128xf32, #tpu.memory_space<vmem>>, vector<128x128xf32>
        %cst_21 = arith.constant dense<0.000000e+00> : vector<128x128xf32>
        %36 = tpu.matmul %29, %35, %cst_21 {dimension_numbers = #tpu.dot_dimension_numbers<[1], [0], [0], [1], [0, 0, 1, 1], [], []>} : vector<128x128xf32>, vector<128x128xf32>, vector<128x128xf32> -> vector<128x128xf32>
        %c0_22 = arith.constant 0 : index
        %c0_23 = arith.constant 0 : index
        %37 = vector.load %arg6[%c0_22, %c0_23] : memref<1x128xf32, #tpu.memory_space<vmem>>, vector<1x128xf32>
        %38 = vector.broadcast %37 : vector<1x128xf32> to vector<128x128xf32>
        %39 = arith.addf %36, %38 : vector<128x128xf32>
        %cst_24 = arith.constant 0.000000e+00 : f32
        %40 = vector.broadcast %cst_24 : f32 to vector<128x128xf32>
        %41 = arith.maximumf %39, %40 : vector<128x128xf32>
        %c0_25 = arith.constant 0 : index
        %c0_26 = arith.constant 0 : index
        %42 = vector.load %arg7[%c0_25, %c0_26] : memref<128x128xf32, #tpu.memory_space<vmem>>, vector<128x128xf32>
        %cst_27 = arith.constant dense<0.000000e+00> : vector<128x128xf32>
        %43 = tpu.matmul %41, %42, %cst_27 {dimension_numbers = #tpu.dot_dimension_numbers<[1], [0], [0], [1], [0, 0, 1, 1], [], []>} : vector<128x128xf32>, vector<128x128xf32>, vector<128x128xf32> -> vector<128x128xf32>
        %c0_28 = arith.constant 0 : index
        %c0_29 = arith.constant 0 : index
        %44 = vector.load %arg8[%c0_28, %c0_29] : memref<1x128xf32, #tpu.memory_space<vmem>>, vector<1x128xf32>
        %45 = vector.broadcast %44 : vector<1x128xf32> to vector<128x128xf32>
        %46 = arith.addf %43, %45 : vector<128x128xf32>
        %47 = tpu.iota {dimensions = array<i32: 1>} : vector<128x128xi32>
        %c4_i32 = arith.constant 4 : i32
        %48 = vector.broadcast %c4_i32 : i32 to vector<128x128xi32>
        %49 = arith.cmpi slt, %47, %48 : vector<128x128xi32>
        %cst_30 = arith.constant -1.000000e+30 : f32
        %50 = vector.broadcast %cst_30 : f32 to vector<128x128xf32>
        %51 = arith.select %49, %46, %50 : vector<128x128xi1>, vector<128x128xf32>
        %cst_31 = arith.constant dense<0xFF800000> : vector<128xf32>
        %52 = vector.multi_reduction <maximumf>, %51, %cst_31 [1] : vector<128x128xf32> to vector<128xf32>
        %53 = vector.shape_cast %52 : vector<128xf32> to vector<128x1xf32>
        %54 = vector.broadcast %53 : vector<128x1xf32> to vector<128x128xf32>
        %55 = arith.subf %51, %54 : vector<128x128xf32>
        %56 = math.exp %55 : vector<128x128xf32>
        %cst_32 = arith.constant dense<0.000000e+00> : vector<128xf32>
        %57 = vector.multi_reduction <add>, %56, %cst_32 [1] : vector<128x128xf32> to vector<128xf32>
        %58 = vector.shape_cast %57 : vector<128xf32> to vector<128x1xf32>
        %59 = math.log %58 : vector<128x1xf32>
        %60 = vector.broadcast %59 : vector<128x1xf32> to vector<128x128xf32>
        %61 = arith.subf %55, %60 : vector<128x128xf32>
        %62 = arith.index_cast %1 : i32 to index
        %c0_33 = arith.constant 0 : index
        %63 = vector.load %arg9[%62, %c0_33] : memref<128x128xf32, #tpu.memory_space<vmem>>, vector<128x128xf32>
        tpu.vector_store %arg9[%62, %c0_33], %61 {strides = array<i32>} : memref<128x128xf32, #tpu.memory_space<vmem>>, vector<128x128xf32>,
      } else {
      }
    } else {
    }
    %c1_i32_9 = arith.constant 1 : i32
    %17 = arith.andi %arg0, %c1_i32_9 : i32
    %c1_i32_10 = arith.constant 1 : i32
    %18 = arith.cmpi eq, %17, %c1_i32_10 : i32
    %19 = arith.extui %18 : i1 to i32
    %cst_11 = arith.constant 5.000000e-02 : f32
    %cst_12 = arith.constant 0.949999988 : f32
    %c0_i32_13 = arith.constant 0 : i32
    %20 = arith.cmpi ne, %19, %c0_i32_13 : i32
    scf.if %20 {
      %c0_14 = arith.constant 0 : index
      %c0_15 = arith.constant 0 : index
      %21 = vector.load %arg11[%c0_14, %c0_15] : memref<128x128xf32, #tpu.memory_space<vmem>>, vector<128x128xf32>
      %cst_16 = arith.constant dense<0.000000e+00> : vector<128x128xf32>
      %22 = tpu.matmul %12, %21, %cst_16 {dimension_numbers = #tpu.dot_dimension_numbers<[1], [0], [0], [1], [0, 0, 1, 1], [], []>} : vector<128x128xf32>, vector<128x128xf32>, vector<128x128xf32> -> vector<128x128xf32>
      %23 = vector.broadcast %cst_11 : f32 to vector<128x128xf32>
      %24 = arith.mulf %23, %3 : vector<128x128xf32>
      %25 = vector.broadcast %cst_12 : f32 to vector<128x1xf32>
      %26 = arith.mulf %25, %4 : vector<128x1xf32>
      %27 = vector.broadcast %26 : vector<128x1xf32> to vector<128x128xf32>
      %28 = arith.mulf %27, %22 : vector<128x128xf32>
      %29 = arith.addf %24, %28 : vector<128x128xf32>
      %30 = arith.index_cast %1 : i32 to index
      %c0_17 = arith.constant 0 : index
      %31 = vector.load %arg10[%30, %c0_17] : memref<128x128xf32, #tpu.memory_space<vmem>>, vector<128x128xf32>
      tpu.vector_store %arg10[%30, %c0_17], %29 {strides = array<i32>} : memref<128x128xf32, #tpu.memory_space<vmem>>, vector<128x128xf32>,
      %c9_i32 = arith.constant 9 : i32
      %32 = arith.cmpi eq, %arg0, %c9_i32 : i32
      %33 = arith.extui %32 : i1 to i32
      %c0_i32_18 = arith.constant 0 : i32
      %34 = arith.cmpi ne, %33, %c0_i32_18 : i32
      scf.if %34 {
        %c0_19 = arith.constant 0 : index
        %c0_20 = arith.constant 0 : index
        %35 = vector.load %arg5[%c0_19, %c0_20] : memref<128x128xf32, #tpu.memory_space<vmem>>, vector<128x128xf32>
        %cst_21 = arith.constant dense<0.000000e+00> : vector<128x128xf32>
        %36 = tpu.matmul %29, %35, %cst_21 {dimension_numbers = #tpu.dot_dimension_numbers<[1], [0], [0], [1], [0, 0, 1, 1], [], []>} : vector<128x128xf32>, vector<128x128xf32>, vector<128x128xf32> -> vector<128x128xf32>
        %c0_22 = arith.constant 0 : index
        %c0_23 = arith.constant 0 : index
        %37 = vector.load %arg6[%c0_22, %c0_23] : memref<1x128xf32, #tpu.memory_space<vmem>>, vector<1x128xf32>
        %38 = vector.broadcast %37 : vector<1x128xf32> to vector<128x128xf32>
        %39 = arith.addf %36, %38 : vector<128x128xf32>
        %cst_24 = arith.constant 0.000000e+00 : f32
        %40 = vector.broadcast %cst_24 : f32 to vector<128x128xf32>
        %41 = arith.maximumf %39, %40 : vector<128x128xf32>
        %c0_25 = arith.constant 0 : index
        %c0_26 = arith.constant 0 : index
        %42 = vector.load %arg7[%c0_25, %c0_26] : memref<128x128xf32, #tpu.memory_space<vmem>>, vector<128x128xf32>
        %cst_27 = arith.constant dense<0.000000e+00> : vector<128x128xf32>
        %43 = tpu.matmul %41, %42, %cst_27 {dimension_numbers = #tpu.dot_dimension_numbers<[1], [0], [0], [1], [0, 0, 1, 1], [], []>} : vector<128x128xf32>, vector<128x128xf32>, vector<128x128xf32> -> vector<128x128xf32>
        %c0_28 = arith.constant 0 : index
        %c0_29 = arith.constant 0 : index
        %44 = vector.load %arg8[%c0_28, %c0_29] : memref<1x128xf32, #tpu.memory_space<vmem>>, vector<1x128xf32>
        %45 = vector.broadcast %44 : vector<1x128xf32> to vector<128x128xf32>
        %46 = arith.addf %43, %45 : vector<128x128xf32>
        %47 = tpu.iota {dimensions = array<i32: 1>} : vector<128x128xi32>
        %c4_i32 = arith.constant 4 : i32
        %48 = vector.broadcast %c4_i32 : i32 to vector<128x128xi32>
        %49 = arith.cmpi slt, %47, %48 : vector<128x128xi32>
        %cst_30 = arith.constant -1.000000e+30 : f32
        %50 = vector.broadcast %cst_30 : f32 to vector<128x128xf32>
        %51 = arith.select %49, %46, %50 : vector<128x128xi1>, vector<128x128xf32>
        %cst_31 = arith.constant dense<0xFF800000> : vector<128xf32>
        %52 = vector.multi_reduction <maximumf>, %51, %cst_31 [1] : vector<128x128xf32> to vector<128xf32>
        %53 = vector.shape_cast %52 : vector<128xf32> to vector<128x1xf32>
        %54 = vector.broadcast %53 : vector<128x1xf32> to vector<128x128xf32>
        %55 = arith.subf %51, %54 : vector<128x128xf32>
        %56 = math.exp %55 : vector<128x128xf32>
        %cst_32 = arith.constant dense<0.000000e+00> : vector<128xf32>
        %57 = vector.multi_reduction <add>, %56, %cst_32 [1] : vector<128x128xf32> to vector<128xf32>
        %58 = vector.shape_cast %57 : vector<128xf32> to vector<128x1xf32>
        %59 = math.log %58 : vector<128x1xf32>
        %60 = vector.broadcast %59 : vector<128x1xf32> to vector<128x128xf32>
        %61 = arith.subf %55, %60 : vector<128x128xf32>
        %62 = arith.index_cast %1 : i32 to index
        %c0_33 = arith.constant 0 : index
        %63 = vector.load %arg9[%62, %c0_33] : memref<128x128xf32, #tpu.memory_space<vmem>>, vector<128x128xf32>
        tpu.vector_store %arg9[%62, %c0_33], %61 {strides = array<i32>} : memref<128x128xf32, #tpu.memory_space<vmem>>, vector<128x128xf32>,
      } else {
      }
    } else {
    }
    return
  }
  func.func @transform_0(%arg0: i32, %arg1: i32) -> (i32, i32) {
    %c0_i32 = arith.constant 0 : i32
    %c0_i32_0 = arith.constant 0 : i32
    %c0_i32_1 = arith.constant 0 : i32
    return %c0_i32, %c0_i32_0 : i32, i32
  }
  func.func @transform_1(%arg0: i32, %arg1: i32) -> (i32, i32) {
    %c0_i32 = arith.constant 0 : i32
    %c0_i32_0 = arith.constant 0 : i32
    %c0_i32_1 = arith.constant 0 : i32
    return %c0_i32, %c0_i32_0 : i32, i32
  }
  func.func @transform_2(%arg0: i32, %arg1: i32) -> (i32, i32) {
    %c0_i32 = arith.constant 0 : i32
    %c0_i32_0 = arith.constant 0 : i32
    return %arg1, %c0_i32 : i32, i32
  }
  func.func @transform_3(%arg0: i32, %arg1: i32) -> (i32, i32) {
    %c0_i32 = arith.constant 0 : i32
    %c0_i32_0 = arith.constant 0 : i32
    %c0_i32_1 = arith.constant 0 : i32
    return %c0_i32, %c0_i32_0 : i32, i32
  }
  func.func @transform_4(%arg0: i32, %arg1: i32) -> (i32, i32) {
    %c0_i32 = arith.constant 0 : i32
    %c0_i32_0 = arith.constant 0 : i32
    %c0_i32_1 = arith.constant 0 : i32
    return %c0_i32, %c0_i32_0 : i32, i32
  }
  func.func @transform_5(%arg0: i32, %arg1: i32) -> (i32, i32) {
    %c0_i32 = arith.constant 0 : i32
    %c0_i32_0 = arith.constant 0 : i32
    %c0_i32_1 = arith.constant 0 : i32
    return %c0_i32, %c0_i32_0 : i32, i32
  }
  func.func @transform_6(%arg0: i32, %arg1: i32) -> (i32, i32) {
    %c0_i32 = arith.constant 0 : i32
    %c0_i32_0 = arith.constant 0 : i32
    %c0_i32_1 = arith.constant 0 : i32
    return %c0_i32, %c0_i32_0 : i32, i32
  }
  func.func @transform_7(%arg0: i32, %arg1: i32) -> (i32, i32) {
    %c0_i32 = arith.constant 0 : i32
    %c0_i32_0 = arith.constant 0 : i32
    %c0_i32_1 = arith.constant 0 : i32
    return %c0_i32, %c0_i32_0 : i32, i32
  }
}

</mosaic_0001>

<bundles_post_ra>
// kernel: tpu_custom_call.1
= control target key start
LH: loop header
LB: loop body
LE: loop exit
PB: predicated region body
PF: predicated region fallthrough
CT: control target
= control target key end

     0   :  { %12 = vsyncpa [#allocation5], 0  ;;  %s4463_s0 = inlined_call_operand.vmem [shape: f32[128,128], index: 0, kind: input, shape index: {}]   ;;  %s4464_s1 = inlined_call_operand.hbm [shape: bf16[128,128], index: 1, kind: input, shape index: {}]   ;;  %s4465_s2 = inlined_call_operand.vmem [shape: f32[128,1], index: 2, kind: input, shape index: {}]   ;;  %s4466_s3 = inlined_call_operand.hbm [shape: f32[128,128], index: 3, kind: input, shape index: {}]   ;;  %s4467_s4 = inlined_call_operand.vmem [shape: f32[1,128], index: 4, kind: input, shape index: {}]   ;;  %s4468_s5 = inlined_call_operand.hbm [shape: f32[128,128], index: 5, kind: input, shape index: {}]   ;;  %s4469_s6 = inlined_call_operand.vmem [shape: f32[1,128], index: 6, kind: input, shape index: {}]   ;;  %s4470_s7 = inlined_call_operand.hbm [shape: f32[128,128], index: 7, kind: output, shape index: {}]  }
   0x1   :  { %13 = vsyncpa [#allocation8], 0 }
   0x2   :  { %14 = vsyncpa [#allocation6], 0  ;;  %s3522_s24 = smov 0   ;;  %s3524_s25 = smov 0  }
   0x3   :  { %s3526_s26 = smov 0  }
   0x4 LB: > { %s3470_s27 = smov [#allocation7]   ;;  %s4474_s29 = sadd.s32 4294967295, %s3468_s26   ;;  %s3468_s26 = sphi %s3526_s26, %s20_s26   ;;  %s3464_s25 = sphi %s3524_s25, %s4557_s25   ;;  %s3460_s24 = sphi %s3522_s24, %s4556_s24  }
   0x5   : > { %s247_s28 = sshll.u32 %s3470_s27, 4  ;;  %p2308_p0 = scmp.ge.s32.totalorder %s3468_s26, 1  ;;  %s3546_s28 = int_to_ptr.vmem [resolvable:$true] %s247_s28 }
   0x6   : > { %p210_p1 = scmp.lt.s32.totalorder %s3468_s26, 11  ;;  %p3542_p2 = scmp.eq.s32.totalorder %s4474_s29, 0 }
   0x7   : > { %s32_s10 = sadd.s32 1, %s3464_s25  ;;  %s3471_s12 = smov [#allocation4]  }
   0x8   : > { %s4504_s30 = scalar_select %p3542_p2, 1, 0 }
   0x9   : > { %p3548_p3 = pnand %p2308_p0, %p210_p1  ;;  %p3561_p6 = scmp.ge.s32.totalorder %s32_s10, 10 }
   0xa   : > { %s225_s13 = sshll.u32 %s3471_s12, 4  ;;  %s3324_s16 = scalar_lea.hbm %s4466_s3, 2048  ;;  %s226_s13 = int_to_ptr.vmem [resolvable:$true] %s225_s13 }
   0xb   : > { %s4505_s8 = scalar_select %p3548_p3, 1, 0 }
   0xc   : > { %p3138_p4 = pneg %p3548_p3  ;;  %p3325_p7 = scmp.ne.s32.totalorder %s4466_s3, %s3324_s16 }
   0xd   : > { %p3331_p11 = scmp.lt.u32.totalorder %s3324_s16, %s4466_s3 }
   0xe   : > { %p3556_p5 = pnand %p3542_p2, %p3138_p4 }
  0x10   : > { %p3573_p8 = pneg %p3556_p5 }
  0x12   : > { %p3327_p9 = pnand %p3573_p8, %p3325_p7 }
  0x14   : > { %p3328_p10 = pneg %p3327_p9 }
  0x16   : > { %p3333_p12 = pnand %p3331_p11, %p3328_p10 }
  0x18   : > { %3336 = shalt.err (!%p3333_p12)
}
  0x19   : > { %s3337_s22 = scalar_lea.vmem %s3546_s28, 2048  ;;  %p3345_p4 = scmp.lt.s32.totalorder %s3546_s28, %s3546_s28 }
  0x1a   : > { %p3338_p13 = scmp.ne.s32.totalorder %s3546_s28, %s3337_s22  ;;  %p3346_p2 = scmp.lt.s32.totalorder %s3337_s22, %s3337_s22 }
  0x1c   : > { %p3340_p0 = pnand %p3338_p13, %p3573_p8  ;;  %p3347_p7 = por %p3346_p2, %p3345_p4 }
  0x1e   : > { %p3341_p1 = pneg %p3340_p0 }
  0x20   : > { %p3348_p9 = pnand %p3347_p7, %p3341_p1 }
  0x22   : > { %3351 = shalt.err (!%p3348_p9)
}
  0x23   : > { %s4475_s23 = smov 128   ;;  %s3473_s27 = smov 8  }
  0x24   : > { %3144 = dma.hbm_to_vmem [thread:$0]  (!%p3556_p5), %s4466_s3, 2048, %s3546_s28, [#allocation8], %s4475_s23, %s4475_s23, %s3473_s27  }
  0x25   : > { %s4559_s10 = smov (%p3561_p6, %s32_s10), 0  ;;  %s3352_s17 = scalar_lea.hbm %s4464_s1, 1024 }
  0x26   : > { %p3353_p2 = scmp.ne.s32.totalorder %s4464_s1, %s3352_s17  ;;  %p3359_p12 = scmp.lt.u32.totalorder %s3352_s17, %s4464_s1 }
  0x28   : > { %p3355_p10 = pnand %p3353_p2, %p3573_p8 }
  0x2a   : > { %p3356_p11 = pneg %p3355_p10 }
  0x2c   : > { %p3361_p13 = pnand %p3359_p12, %p3356_p11 }
  0x2e   : > { %3364 = shalt.err (!%p3361_p13)
}
  0x2f   : > { %s3365_s28 = scalar_lea.vmem %s226_s13, 1024  ;;  %p3373_p4 = scmp.lt.s32.totalorder %s226_s13, %s226_s13 }
  0x30   : > { %p3366_p6 = scmp.ne.s32.totalorder %s226_s13, %s3365_s28  ;;  %p3374_p7 = scmp.lt.s32.totalorder %s3365_s28, %s3365_s28 }
  0x32   : > { %p3368_p0 = pnand %p3366_p6, %p3573_p8  ;;  %p3375_p9 = por %p3374_p7, %p3373_p4 }
  0x34   : > { %p3369_p1 = pneg %p3368_p0 }
  0x36   : > { %p3376_p3 = pnand %p3375_p9, %p3369_p1 }
  0x38   : > { %3379 = shalt.err (!%p3376_p3)
}
  0x39   : > { %s3474_s11 = smov 64   ;;  %s3475_s12 = smov 4  }
  0x3a   : > { %3141 = dma.hbm_to_vmem [thread:$0]  (!%p3556_p5), %s4464_s1, 1024, %s226_s13, [#allocation5], %s3474_s11, %s3474_s11, %s3475_s12  }
  0x3b   : > { %s3476_s16 = smov [#allocation9]   ;;  %s3380_s21 = scalar_lea.hbm %s4468_s5, 2048 }
  0x3c   : > { %s263_s17 = sshll.u32 %s3476_s16, 4  ;;  %p3381_p3 = scmp.ne.s32.totalorder %s4468_s5, %s3380_s21  ;;  %s264_s17 = int_to_ptr.vmem [resolvable:$true] %s263_s17 }
  0x3d   : > { %p3387_p11 = scmp.lt.u32.totalorder %s3380_s21, %s4468_s5 }
  0x3e   : > { %p3383_p2 = pnand %p3381_p3, %p3573_p8 }
  0x40   : > { %p3384_p10 = pneg %p3383_p2 }
  0x42   : > { %p3389_p12 = pnand %p3387_p11, %p3384_p10 }
  0x44   : > { %3392 = shalt.err (!%p3389_p12)
}
  0x45   : > { %s3393_s13 = scalar_lea.vmem %s264_s17, 2048  ;;  %p3401_p1 = scmp.lt.s32.totalorder %s264_s17, %s264_s17 }
  0x46   : > { %p3394_p13 = scmp.ne.s32.totalorder %s264_s17, %s3393_s13  ;;  %p3402_p4 = scmp.lt.s32.totalorder %s3393_s13, %s3393_s13 }
  0x48   : > { %p3396_p6 = pnand %p3394_p13, %p3573_p8  ;;  %p3403_p7 = por %p3402_p4, %p3401_p1 }
  0x4a   : > { %p3397_p0 = pneg %p3396_p6 }
  0x4c   : > { %p3404_p9 = pnand %p3403_p7, %p3397_p0 }
  0x4e   : > { %3407 = shalt.err (!%p3404_p9)
}
  0x4f   : > { %s4509_s11 = smov 128   ;;  %p4510_p3 = scmp.ne.s32.totalorder %s4505_s8, 0 }
  0x50   : > { %3147 = dma.hbm_to_vmem [thread:$0]  (!%p3556_p5), %s4468_s5, 2048, %s264_s17, [#allocation8], %s4509_s11, %s4509_s11, %s3473_s27  }
  0x51   : > { %282 = sbr.rel (%p4510_p3) target bundleno = 2301 (0x8fd), region = 48 }
  0x58   : > { %p4511_p8 = scmp.ne.s32.totalorder %s4504_s30, 0 }
  0x5a   : > { %3447 = dma.done.wait (%p4511_p8), [#allocation5], 1024  }
  0x5b   : > { %3449 = vsyncadd (%p4511_p8), [#allocation5], 4294966272 }
  0x5c   : > { %3451 = dma.done.wait (%p4511_p8), [#allocation8], 4096  }
  0x5d   : > { %3453 = vsyncadd (%p4511_p8), [#allocation8], 4294963200  ;;  %p357_p2 = scmp.eq.s32.totalorder %s3460_s24, 0  ;;  %v3654_v0 = vld [vmem:[%s4463_s0] sm:$0xff]  ;;  %v3659_v1 = vld [vmem:[%s4463_s0 + $0x8] sm:$0xff] }
  0x5e   : > { %4512 = vst [vmem:[#allocation14_spill] sm:$0xff] %v3654_v0  ;;  %4513 = vst [vmem:[#allocation15_spill] sm:$0xff] %v3659_v1  ;;  %v3664_v2 = vld [vmem:[%s4463_s0 + $0x10] sm:$0xff]  ;;  %v3669_v3 = vld [vmem:[%s4463_s0 + $0x18] sm:$0xff] }
  0x5f   : > { %v3674_v4 = vld [vmem:[%s4463_s0 + $0x20] sm:$0xff]  ;;  %v3679_v5 = vld [vmem:[%s4463_s0 + $0x28] sm:$0xff]  ;;  %v3684_v6 = vld [vmem:[%s4463_s0 + $0x30] sm:$0xff] }
  0x60   : > { %4514 = vst [vmem:[#allocation16_spill] sm:$0xff] %v3684_v6  ;;  %v3689_v7 = vld [vmem:[%s4463_s0 + $0x38] sm:$0xff]  ;;  %v3694_v8 = vld [vmem:[%s4463_s0 + $0x40] sm:$0xff]  ;;  %v3699_v9 = vld [vmem:[%s4463_s0 + $0x48] sm:$0xff] }
  0x61   : > { %4515 = vst [vmem:[#allocation17_spill] sm:$0xff] %v3699_v9  ;;  %v3704_v10 = vld [vmem:[%s4463_s0 + $0x50] sm:$0xff]  ;;  %v3709_v11 = vld [vmem:[%s4463_s0 + $0x58] sm:$0xff]  ;;  %v3714_v12 = vld [vmem:[%s4463_s0 + $0x60] sm:$0xff] }
  0x62   : > { %4516 = vst [vmem:[#allocation18_spill] sm:$0xff] %v3714_v12  ;;  %v3719_v13 = vld [vmem:[%s4463_s0 + $0x68] sm:$0xff]  ;;  %v3724_v14 = vld [vmem:[%s4463_s0 + $0x70] sm:$0xff]  ;;  %v3729_v15 = vld [vmem:[%s4463_s0 + $0x78] sm:$0xff]  ;;  %362 = sbr.rel (!%p357_p2) target bundleno = 118 (0x76), region = 64 }
  0x63   : > { %4517 = vst [vmem:[#allocation19_spill] sm:$0xff] %v3724_v14  ;;  %v3734_v16 = vld [vmem:[%s4465_s2] sm:$0xff]  ;;  %v3739_v17 = vld [vmem:[%s4465_s2 + $0x8] sm:$0xff]  ;;  %v3744_v18 = vld [vmem:[%s4465_s2 + $0x10] sm:$0xff] }
  0x64   : > { %v3749_v19 = vld [vmem:[%s4465_s2 + $0x18] sm:$0xff]  ;;  %v3754_v20 = vld [vmem:[%s4465_s2 + $0x20] sm:$0xff]  ;;  %v3759_v21 = vld [vmem:[%s4465_s2 + $0x28] sm:$0xff] }
  0x65   : > { %v3764_v22 = vld [vmem:[%s4465_s2 + $0x30] sm:$0xff]  ;;  %v3769_v23 = vld [vmem:[%s4465_s2 + $0x38] sm:$0xff]  ;;  %v3774_v24 = vld [vmem:[%s4465_s2 + $0x40] sm:$0xff] }
  0x66   : > { %v3779_v25 = vld [vmem:[%s4465_s2 + $0x48] sm:$0xff]  ;;  %v3784_v26 = vld [vmem:[%s4465_s2 + $0x50] sm:$0xff]  ;;  %v3789_v27 = vld [vmem:[%s4465_s2 + $0x58] sm:$0xff] }
  0x67   : > { %v3794_v28 = vld [vmem:[%s4465_s2 + $0x60] sm:$0xff]  ;;  %v3799_v29 = vld [vmem:[%s4465_s2 + $0x68] sm:$0xff]  ;;  %v3804_v30 = vld [vmem:[%s4465_s2 + $0x70] sm:$0xff] }
  0x68   : > { %v3809_v31 = vld [vmem:[%s4465_s2 + $0x78] sm:$0xff]  ;;  %v363_v32 = vld [vmem:[%s4463_s0] sm:$0xff] (%p357_p2)  ;;  %v364_v33 = vld [vmem:[%s4463_s0 + $0x8] sm:$0xff] (%p357_p2) }
  0x69   : > { %v365_v34 = vld [vmem:[%s4463_s0 + $0x10] sm:$0xff]  ;;  %v379_v35 = vmul.f32 0.05, %v363_v32  ;;  %v380_v36 = vmul.f32 0.05, %v364_v33  ;;  %v366_v38 = vld [vmem:[%s4463_s0 + $0x18] sm:$0xff] }
  0x6a   : > { %v381_v37 = vmul.f32 0.05, %v365_v34  ;;  %v367_v39 = vld [vmem:[%s4463_s0 + $0x20] sm:$0xff]  ;;  %v368_v40 = vld [vmem:[%s4463_s0 + $0x28] sm:$0xff]  ;;  %v382_v41 = vmul.f32 0.05, %v366_v38 }
  0x6b   : > { %395 = vst [vmem:[#allocation2] sm:$0xff] %v379_v35  ;;  %396 = vst [vmem:[#allocation2 + $0x8] sm:$0xff] %v380_v36  ;;  %v383_v42 = vmul.f32 0.05, %v367_v39  ;;  %v384_v43 = vmul.f32 0.05, %v368_v40 }
  0x6c   : > { %397 = vst [vmem:[#allocation2 + $0x10] sm:$0xff] %v381_v37  ;;  %v369_v44 = vld [vmem:[%s4463_s0 + $0x30] sm:$0xff]  ;;  %v370_v45 = vld [vmem:[%s4463_s0 + $0x38] sm:$0xff]  ;;  %v371_v46 = vld [vmem:[%s4463_s0 + $0x40] sm:$0xff] }
  0x6d   : > { %398 = vst [vmem:[#allocation2 + $0x18] sm:$0xff] %v382_v41  ;;  %399 = vst [vmem:[#allocation2 + $0x20] sm:$0xff] %v383_v42  ;;  %v385_v47 = vmul.f32 0.05, %v369_v44  ;;  %v386_v48 = vmul.f32 0.05, %v370_v45 }
  0x6e   : > { %400 = vst [vmem:[#allocation2 + $0x28] sm:$0xff] %v384_v43  ;;  %v387_v49 = vmul.f32 0.05, %v371_v46  ;;  %v372_v50 = vld [vmem:[%s4463_s0 + $0x48] sm:$0xff]  ;;  %v373_v51 = vld [vmem:[%s4463_s0 + $0x50] sm:$0xff]  ;;  %v374_v52 = vld [vmem:[%s4463_s0 + $0x58] sm:$0xff] }
  0x6f   : > { %401 = vst [vmem:[#allocation2 + $0x30] sm:$0xff] %v385_v47  ;;  %402 = vst [vmem:[#allocation2 + $0x38] sm:$0xff] %v386_v48  ;;  %v388_v53 = vmul.f32 0.05, %v372_v50  ;;  %v389_v54 = vmul.f32 0.05, %v373_v51 }
  0x70   : > { %403 = vst [vmem:[#allocation2 + $0x40] sm:$0xff] %v387_v49  ;;  %v390_v55 = vmul.f32 0.05, %v374_v52  ;;  %v375_v56 = vld [vmem:[%s4463_s0 + $0x60] sm:$0xff]  ;;  %v376_v57 = vld [vmem:[%s4463_s0 + $0x68] sm:$0xff]  ;;  %v377_v58 = vld [vmem:[%s4463_s0 + $0x70] sm:$0xff] }
  0x71   : > { %404 = vst [vmem:[#allocation2 + $0x48] sm:$0xff] %v388_v53  ;;  %405 = vst [vmem:[#allocation2 + $0x50] sm:$0xff] %v389_v54  ;;  %v391_v59 = vmul.f32 0.05, %v375_v56  ;;  %v392_v60 = vmul.f32 0.05, %v376_v57 }
  0x72   : > { %406 = vst [vmem:[#allocation2 + $0x58] sm:$0xff] %v390_v55  ;;  %v393_v61 = vmul.f32 0.05, %v377_v58  ;;  %v378_v62 = vld [vmem:[%s4463_s0 + $0x78] sm:$0xff] }
  0x73   : > { %407 = vst [vmem:[#allocation2 + $0x60] sm:$0xff] %v391_v59  ;;  %408 = vst [vmem:[#allocation2 + $0x68] sm:$0xff] %v392_v60  ;;  %v394_v63 = vmul.f32 0.05, %v378_v62 }
  0x74   : > { %409 = vst [vmem:[#allocation2 + $0x70] sm:$0xff] %v393_v61 }
  0x75   : > { %410 = vst [vmem:[#allocation2 + $0x78] sm:$0xff] %v394_v63 }
  0x76 PF: > { %v3861_v32 = vld [vmem:[#allocation4] sm:$0xff]   ;;  %v3863_v33 = vld [vmem:[#allocation4 + $0x8] sm:$0xff]   ;;  %v3865_v34 = vld [vmem:[#allocation4 + $0x10] sm:$0xff]   ;;  %s447_s19 = sand.u32 1, %s3460_s24 }
  0x77   : > { %4518 = vst [vmem:[#allocation20_spill] sm:$0xff] %v3865_v34  ;;  %v4477_v35 = vunpack.c.l.bf16 %v3861_v32  ;;  %v4487_v36 = vunpack.c.h.bf16 %v3861_v32  ;;  %v4485_v37 = vunpack.c.l.bf16 %v3863_v33  ;;  %v4483_v38 = vunpack.c.h.bf16 %v3863_v33  ;;  %v3872_v39 = vld [vmem:[#allocation4 + $0x18] sm:$0xff]   ;;  %v3874_v40 = vld [vmem:[#allocation4 + $0x20] sm:$0xff]   ;;  %v3876_v41 = vld [vmem:[#allocation4 + $0x28] sm:$0xff]   ;;  %p2318_p5 = scmp.ne.s32.totalorder %s447_s19, 0 }
  0x78   : > { %4519 = vst [vmem:[#allocation21_spill] sm:$0xff] %v3872_v39  ;;  %4520 = vst [vmem:[#allocation22_spill] sm:$0xff] %v3876_v41  ;;  %v4481_v42 = vunpack.c.l.bf16 %v3865_v34  ;;  %v4479_v43 = vunpack.c.h.bf16 %v3865_v34  ;;  %v3882_v46 = vld [vmem:[#allocation4 + $0x30] sm:$0xff]   ;;  %v3884_v47 = vld [vmem:[#allocation4 + $0x38] sm:$0xff]   ;;  %v4476_v48 = vunpack.c.l.bf16 %v3874_v40  ;;  %v4486_v49 = vunpack.c.h.bf16 %v3874_v40  ;;  %p2319_p10 = scmp.ne.s32.totalorder (!%p2318_p5), %s3460_s24, 9 }
  0x79   : > { %4521 = vst [vmem:[#allocation23_spill] sm:$0xff] %v3882_v46  ;;  %4522 = vst [vmem:[#allocation24_spill] sm:$0xff] %v3884_v47  ;;  %v4484_v50 = vunpack.c.l.bf16 %v3876_v41  ;;  %v4482_v51 = vunpack.c.h.bf16 %v3876_v41  ;;  %v4480_v52 = vunpack.c.l.bf16 %v3882_v46  ;;  %v4478_v53 = vunpack.c.h.bf16 %v3882_v46  ;;  %451 = sbr.rel (%p2318_p5) target bundleno = 1198 (0x4ae), region = 68  ;;  %v452_v56 = vld [vmem:[#allocation2] sm:$0xff] (!%p2318_p5)  ;;  %v453_v57 = vld [vmem:[#allocation2 + $0x8] sm:$0xff] (!%p2318_p5)  ;;  %2594 = vmatprep.mubr.f32.mxu0 (!%p2318_p5), %v4477_v35 }
  0x7a   : > { %v454_v58 = vld [vmem:[#allocation2 + $0x10] sm:$0xff] (!%p2318_p5)  ;;  %2606 = vmatprep.mubr.f32.mxu1 (!%p2318_p5), %v4476_v48  ;;  %v631_v59 = vmul.f32 (!%p2318_p5), 0.95, %v3744_v18  ;;  %v2898_v60 = vpack.c.bf16 (!%p2318_p5), %v453_v57, %v452_v56  ;;  %v455_v61 = vld [vmem:[#allocation2 + $0x18] sm:$0xff] (!%p2318_p5)  ;;  %v3477_v62 = vmov (!%p2318_p5), 0   ;;  %v456_v55 = vld [vmem:[#allocation2 + $0x20] sm:$0xff] (!%p2318_p5) }
  0x7b   : > { %3193 = vset.pattern.permute.xlu1 (!%p2318_p5), %v3477_v62  ;;  %3192 = vset.pattern.permute.xlu0 (!%p2318_p5), %v3477_v62  ;;  %v2902_v63 = vpack.c.bf16 (!%p2318_p5), %v455_v61, %v454_v58  ;;  %v457_v45 = vld [vmem:[#allocation2 + $0x28] sm:$0xff] (!%p2318_p5)  ;;  %v629_v54 = vmul.f32 (!%p2318_p5), 0.95, %v3734_v16  ;;  %v632_v44 = vmul.f32 (!%p2318_p5), 0.95, %v3749_v19  ;;  %v458_v56 = vld [vmem:[#allocation2 + $0x30] sm:$0xff] (!%p2318_p5) }
  0x7c   : > { %657 = vperm.xlu1 (!%p2318_p5), %3193, %v631_v59   ;;  %2899 = vmatprep.subr.bf16.mxu0 (!%p2318_p5), %v2898_v60  ;;  %v2906_v48 = vpack.c.bf16 (!%p2318_p5), %v457_v45, %v456_v55  ;;  %v459_v57 = vld [vmem:[#allocation2 + $0x38] sm:$0xff] (!%p2318_p5)  ;;  %v630_v58 = vmul.f32 (!%p2318_p5), 0.95, %v3739_v17  ;;  %v634_v61 = vmul.f32 (!%p2318_p5), 0.95, %v3759_v21  ;;  %v460_v62 = vld [vmem:[#allocation2 + $0x40] sm:$0xff] (!%p2318_p5) }
  0x7d   : > { %3090 = vmatprep.subr.bf16.mxu1 (!%p2318_p5), %v2898_v60  ;;  %2901 = vmatpush3.bf16.msra.mxu0 (!%p2318_p5), %v2898_v60  ;;  %v2910_v59 = vpack.c.bf16 (!%p2318_p5), %v459_v57, %v458_v56  ;;  %v461_v35 = vld [vmem:[#allocation2 + $0x48] sm:$0xff] (!%p2318_p5)  ;;  %v636_v45 = vmul.f32 (!%p2318_p5), 0.95, %v3769_v23  ;;  %v463_v55 = vld [vmem:[#allocation2 + $0x58] sm:$0xff] (!%p2318_p5)  ;;  %v638_v56 = vmul.f32 (!%p2318_p5), 0.95, %v3779_v25 }
  0x7e   : > { %3098 = vmatpush3.bf16.msra.mxu1 (!%p2318_p5), %v2898_v60  ;;  %2903 = vmatprep.subr.bf16.mxu0 (!%p2318_p5), %v2902_v63  ;;  %v633_v60 = vmul.f32 (!%p2318_p5), 0.95, %v3754_v20 }
  0x7f   : > { %3091 = vmatprep.subr.bf16.mxu1 (!%p2318_p5), %v2902_v63  ;;  %647 = vperm.xlu0 (!%p2318_p5), %3192, %v629_v54   ;;  %v462_v54 = vld [vmem:[#allocation2 + $0x50] sm:$0xff] (!%p2318_p5) }
  0x80   : > { %662 = vperm.xlu1 %3193, %v632_v44   ;;  %v2914_v44 = vpack.c.bf16 %v461_v35, %v460_v62  ;;  %v2918_v57 = vpack.c.bf16 %v463_v55, %v462_v54  ;;  %v640_v35 = vmul.f32 0.95, %v3789_v27  ;;  %v642_v54 = vmul.f32 0.95, %v3799_v29 }
  0x81   : > { %2905 = vmatpush3.bf16.msra.mxu0 %v2902_v63 }
  0x82   : > { %3099 = vmatpush3.bf16.msra.mxu1 %v2902_v63  ;;  %2907 = vmatprep.subr.bf16.mxu0 %v2906_v48  ;;  %v635_v63 = vmul.f32 0.95, %v3764_v22 }
  0x83   : > { %3092 = vmatprep.subr.bf16.mxu1 %v2906_v48  ;;  %652 = vperm.xlu0 %3192, %v630_v58   ;;  %v464_v58 = vld [vmem:[#allocation2 + $0x60] sm:$0xff] }
  0x84   : > { %672 = vperm.xlu1 %3193, %v634_v61   ;;  %v465_v61 = vld [vmem:[#allocation2 + $0x68] sm:$0xff] }
  0x85   : > { %2909 = vmatpush3.bf16.msra.mxu0 %v2906_v48  ;;  %v2922_v62 = vpack.c.bf16 %v465_v61, %v464_v58  ;;  %v4524_v58 = vunpack.c.l.bf16 %v3884_v47  ;;  %v4525_v61 = vunpack.c.h.bf16 %v3872_v39 }
  0x86   : > { %3100 = vmatpush3.bf16.msra.mxu1 %v2906_v48  ;;  %2911 = vmatprep.subr.bf16.mxu0 %v2910_v59  ;;  %v637_v48 = vmul.f32 0.95, %v3774_v24 }
  0x87   : > { %3093 = vmatprep.subr.bf16.mxu1 %v2910_v59  ;;  %667 = vperm.xlu0 %3192, %v633_v60   ;;  %v466_v60 = vld [vmem:[#allocation2 + $0x70] sm:$0xff] }
  0x88   : > { %682 = vperm.xlu1 %3193, %v636_v45   ;;  %v467_v45 = vld [vmem:[#allocation2 + $0x78] sm:$0xff] }
  0x89   : > { %2913 = vmatpush3.bf16.msra.mxu0 %v2910_v59  ;;  %v2926_v55 = vpack.c.bf16 %v467_v45, %v466_v60 }
  0x8a   : > { %3101 = vmatpush3.bf16.msra.mxu1 %v2910_v59  ;;  %2915 = vmatprep.subr.bf16.mxu0 %v2914_v44  ;;  %v639_v59 = vmul.f32 0.95, %v3784_v26 }
  0x8b   : > { %3094 = vmatprep.subr.bf16.mxu1 %v2914_v44  ;;  %677 = vperm.xlu0 %3192, %v635_v63   ;;  %v644_v63 = vmul.f32 0.95, %v3809_v31 }
  0x8c   : > { %692 = vperm.xlu1 %3193, %v638_v56   ;;  %v643_v56 = vmul.f32 0.95, %v3804_v30 }
  0x8d   : > { %2917 = vmatpush3.bf16.msra.mxu0 %v2914_v44 }
  0x8e   : > { %3102 = vmatpush3.bf16.msra.mxu1 %v2914_v44  ;;  %2919 = vmatprep.subr.bf16.mxu0 %v2918_v57  ;;  %v641_v44 = vmul.f32 0.95, %v3794_v28 }
  0x8f   : > { %3095 = vmatprep.subr.bf16.mxu1 %v2918_v57  ;;  %687 = vperm.xlu0 %3192, %v637_v48   ;;  %v4526_v48 = vunpack.c.h.bf16 %v3884_v47 }
  0x90   : > { %702 = vperm.xlu1 %3193, %v640_v35  }
  0x91   : > { %2921 = vmatpush3.bf16.msra.mxu0 %v2918_v57 }
  0x92   : > { %3103 = vmatpush3.bf16.msra.mxu1 %v2918_v57  ;;  %2923 = vmatprep.subr.bf16.mxu0 %v2922_v62  ;;  %v4523_v57 = vunpack.c.l.bf16 %v3872_v39 }
  0x93   : > { %3096 = vmatprep.subr.bf16.mxu1 %v2922_v62  ;;  %697 = vperm.xlu0 %3192, %v639_v59  }
  0x94   : > { %712 = vperm.xlu1 %3193, %v642_v54  }
  0x95   : > { %2925 = vmatpush3.bf16.msra.mxu0 %v2922_v62 }
  0x96   : > { %3104 = vmatpush3.bf16.msra.mxu1 %v2922_v62  ;;  %2927 = vmatprep.subr.bf16.mxu0 %v2926_v55 }
  0x97   : > { %3097 = vmatprep.subr.bf16.mxu1 %v2926_v55  ;;  %707 = vperm.xlu0 %3192, %v641_v44  }
  0x98   : > { %722 = vperm.xlu1 %3193, %v644_v63  }
  0x99   : > { %2929 = vmatpush3.bf16.msra.mxu0 %v2926_v55 }
  0x9a   : > { %3105 = vmatpush3.bf16.msra.mxu1 %v2926_v55 }
  0x9b   : > { %717 = vperm.xlu0 %3192, %v643_v56  }
  0x9c   : > { %2595 = vmatmul.mubr.f32.vlgmr.msra.gmra.mrb[0].mxu0 %v4487_v36 }
  0x9d   : > { %2607 = vmatmul.mubr.f32.vlgmr.msra.gmra.mrb[0].mxu1 %v4486_v49  ;;  %2597 = vmatprep.mubr.f32.mxu0 %v4485_v37 }
  0x9e   : > { %2609 = vmatprep.mubr.f32.mxu1 %v4484_v50 }
  0xa0   : > { %2598 = vmatmul.mubr.f32.gmra.mrb[2].mxu0 %v4483_v38 }
  0xa1   : > { %2610 = vmatmul.mubr.f32.gmra.mrb[2].mxu1 %v4482_v51  ;;  %2600 = vmatprep.mubr.f32.mxu0 %v4481_v42  ;;  %v621_v42 = vmul.f32 0.05, %v3694_v8 }
  0xa2   : > { %2612 = vmatprep.mubr.f32.mxu1 %v4480_v52  ;;  %v613_v52 = vmul.f32 0.05, %v3654_v0 }
  0xa4   : > { %2601 = vmatmul.mubr.f32.gmra.mrb[4].mxu0 %v4479_v43 }
  0xa5   : > { %2613 = vmatmul.mubr.f32.gmra.mrb[4].mxu1 %v4478_v53  ;;  %2603 = vmatprep.mubr.f32.mxu0 %v4523_v57  ;;  %v614_v53 = vmul.f32 0.05, %v3659_v1  ;;  %v624_v1 = vmul.f32 0.05, %v3709_v11 }
  0xa6   : > { %2615 = vmatprep.mubr.f32.mxu1 %v4524_v58 }
  0xa8   : > { %2604 = vmatmul.mubr.f32.gmra.mrb[6].mxu0 %v4525_v61  ;;  %v622_v61 = vmul.f32 0.05, %v3699_v9  ;;  %v616_v9 = vmul.f32 0.05, %v3669_v3 }
  0xa9   : > { %2616 = vmatmul.mubr.f32.gmra.mrb[6].mxu1 %v4526_v48 }
  0xfb   : > { %v658_v35 = vpop.permute.xlu1 %657 }
  0xfe   : > { %v648_v62 = vpop.permute.xlu0 %647 }
  0xff   : > { %v663_v60 = vpop.permute.xlu1 %662 }
 0x102   : > { %v653_v45 = vpop.permute.xlu0 %652 }
 0x103   : > { %v673_v59 = vpop.permute.xlu1 %672 }
 0x106   : > { %v668_v54 = vpop.permute.xlu0 %667 }
 0x107   : > { %v3944_v55 = vpop.permute.xlu1 %682 }
 0x10a   : > { %v3946_v44 = vpop.permute.xlu0 %677 }
 0x10b   : > { %v693_v63 = vpop.permute.xlu1 %692 }
 0x10e   : > { %v688_v56 = vpop.permute.xlu0 %687 }
 0x10f   : > { %v703_v57 = vpop.permute.xlu1 %702 }
 0x112   : > { %v698_v58 = vpop.permute.xlu0 %697 }
 0x113   : > { %v713_v47 = vpop.permute.xlu1 %712 }
 0x116   : > { %v708_v39 = vpop.permute.xlu0 %707 }
 0x16f   : > { %v2596_v43 = vpop.f32.mrb[0].mxu0 }
 0x170   : > { %v2608_v48 = vpop.f32.mrb[0].mxu1  ;;  %v726_v51 = vmul.f32 %v2596_v43, %v653_v45  ;;  %v534_v50 = vpop.f32.mrb[1].mxu0 }
 0x171   : > { %v734_v38 = vmul.f32 %v2608_v48, %v693_v63  ;;  %v574_v37 = vpop.f32.mrb[1].mxu1  ;;  %v725_v49 = vmul.f32 %v648_v62, %v534_v50  ;;  %v615_v63 = vmul.f32 0.05, %v3664_v2  ;;  %v618_v62 = vmul.f32 0.05, %v3679_v5 }
 0x172   : > { %v733_v36 = vmul.f32 %v688_v56, %v574_v37  ;;  %v3952_v46 = vadd.f32 %v726_v51, %v614_v53  ;;  %v623_v37 = vmul.f32 0.05, %v3704_v10  ;;  %v626_v56 = vmul.f32 0.05, %v3719_v13 }
 0x173   : > { %v3954_v34 = vadd.f32 %v734_v38, %v622_v61  ;;  %v3958_v41 = vadd.f32 %v725_v49, %v613_v52  ;;  %v2599_v43 = vpop.f32.mrb[2].mxu0 }
 0x174   : > { %v3960_v0 = vadd.f32 %v733_v36, %v621_v42  ;;  %v2611_v45 = vpop.f32.mrb[2].mxu1  ;;  %759 = vst [vmem:[#allocation3 + $0x8] sm:$0xff] %v3952_v46  ;;  %v728_v38 = vmul.f32 %v2599_v43, %v663_v60  ;;  %v544_v51 = vpop.f32.mrb[3].mxu0  ;;  %v617_v43 = vmul.f32 0.05, %v3674_v4 }
 0x175   : > { %767 = vst [vmem:[#allocation3 + $0x48] sm:$0xff] %v3954_v34  ;;  %v736_v50 = vmul.f32 %v2611_v45, %v703_v57  ;;  %v584_v53 = vpop.f32.mrb[3].mxu1  ;;  %758 = vst [vmem:[#allocation3] sm:$0xff] %v3958_v41  ;;  %v727_v36 = vmul.f32 %v658_v35, %v544_v51  ;;  %v625_v45 = vmul.f32 0.05, %v3714_v12  ;;  %2650 = vmatprep.mubr.f32.mxu0 (!%p2319_p10), %v3958_v41 }
 0x176   : > { %766 = vst [vmem:[#allocation3 + $0x40] sm:$0xff] %v3960_v0  ;;  %v735_v42 = vmul.f32 %v698_v58, %v584_v53  ;;  %v3968_v49 = vadd.f32 %v728_v38, %v616_v9  ;;  %v723_v38 = vpop.permute.xlu1 %722  ;;  %v619_v12 = vmul.f32 0.05, %v3684_v6  ;;  %v967_v6 = vld [vmem:[#allocation9 + $0x28] sm:$0xff] (!%p2319_p10) }
 0x177   : > { %v3970_v52 = vadd.f32 %v736_v50, %v624_v1  ;;  %v3974_v61 = vadd.f32 %v727_v36, %v615_v63  ;;  %v2602_v57 = vpop.f32.mrb[4].mxu0  ;;  %v718_v50 = vpop.permute.xlu0 %717  ;;  %v620_v36 = vmul.f32 0.05, %v3689_v7 }
 0x178   : > { %v3976_v60 = vadd.f32 %v735_v42, %v623_v37  ;;  %v2614_v48 = vpop.f32.mrb[4].mxu1  ;;  %761 = vst [vmem:[#allocation3 + $0x18] sm:$0xff] %v3968_v49  ;;  %v730_v1 = vmul.f32 %v2602_v57, %v673_v59  ;;  %v554_v35 = vpop.f32.mrb[5].mxu0  ;;  %v628_v42 = vmul.f32 0.05, %v3729_v15 }
 0x179   : > { %769 = vst [vmem:[#allocation3 + $0x58] sm:$0xff] %v3970_v52  ;;  %v738_v9 = vmul.f32 %v2614_v48, %v713_v47  ;;  %v594_v58 = vpop.f32.mrb[5].mxu1  ;;  %760 = vst [vmem:[#allocation3 + $0x10] sm:$0xff] %v3974_v61  ;;  %v729_v63 = vmul.f32 %v668_v54, %v554_v35 }
 0x17a   : > { %768 = vst [vmem:[#allocation3 + $0x50] sm:$0xff] %v3976_v60  ;;  %v737_v37 = vmul.f32 %v708_v39, %v594_v58  ;;  %v3984_v51 = vadd.f32 %v730_v1, %v618_v62  ;;  %v627_v39 = vmul.f32 0.05, %v3724_v14  ;;  %v966_v14 = vld [vmem:[#allocation9 + $0x20] sm:$0xff] (!%p2319_p10) }
 0x17b   : > { %v3986_v53 = vadd.f32 %v738_v9, %v626_v56  ;;  %v3990_v59 = vadd.f32 %v729_v63, %v617_v43  ;;  %v2605_v57 = vpop.f32.mrb[6].mxu0 }
 0x17c   : > { %v3992_v47 = vadd.f32 %v737_v37, %v625_v45  ;;  %v2617_v48 = vpop.f32.mrb[6].mxu1  ;;  %763 = vst [vmem:[#allocation3 + $0x28] sm:$0xff] %v3984_v51  ;;  %v732_v54 = vmul.f32 %v2605_v57, %v3944_v55  ;;  %v564_v56 = vpop.f32.mrb[7].mxu0  ;;  %777 = sbr.rel (%p2319_p10) target bundleno = 1198 (0x4ae), region = 72  ;;  %v778_v55 = vld [vmem:[#allocation7] sm:$0xff] (!%p2319_p10)  ;;  %v780_v37 = vld [vmem:[#allocation7 + $0x10] sm:$0xff] (!%p2319_p10) }
 0x17d   : > { %771 = vst [vmem:[#allocation3 + $0x68] sm:$0xff] %v3986_v53  ;;  %v740_v62 = vmul.f32 %v2617_v48, %v723_v38  ;;  %v604_v1 = vpop.f32.mrb[7].mxu1  ;;  %762 = vst [vmem:[#allocation3 + $0x20] sm:$0xff] %v3990_v59  ;;  %v731_v43 = vmul.f32 %v3946_v44, %v564_v56  ;;  %v779_v44 = vld [vmem:[#allocation7 + $0x8] sm:$0xff] (!%p2319_p10)  ;;  %v781_v38 = vld [vmem:[#allocation7 + $0x18] sm:$0xff] (!%p2319_p10) }
 0x17e   : > { %770 = vst [vmem:[#allocation3 + $0x60] sm:$0xff] %v3992_v47  ;;  %v739_v45 = vmul.f32 %v718_v50, %v604_v1  ;;  %v4002_v9 = vadd.f32 %v732_v54, %v620_v36  ;;  %v2934_v50 = vpack.c.bf16 (!%p2319_p10), %v781_v38, %v780_v37  ;;  %v782_v36 = vld [vmem:[#allocation7 + $0x20] sm:$0xff] (!%p2319_p10)  ;;  %v784_v48 = vld [vmem:[#allocation7 + $0x30] sm:$0xff] (!%p2319_p10)  ;;  %v963_v54 = vld [vmem:[#allocation9 + $0x8] sm:$0xff] (!%p2319_p10)  ;;  %v2970_v37 = vpack.c.bf16 (!%p2319_p10), %v967_v6, %v966_v14 }
 0x17f   : > { %v4004_v35 = vadd.f32 %v740_v62, %v628_v42  ;;  %v4006_v58 = vadd.f32 %v731_v43, %v619_v12  ;;  %v2930_v12 = vpack.c.bf16 (!%p2319_p10), %v779_v44, %v778_v55  ;;  %v783_v42 = vld [vmem:[#allocation7 + $0x28] sm:$0xff] (!%p2319_p10)  ;;  %v785_v62 = vld [vmem:[#allocation7 + $0x38] sm:$0xff] (!%p2319_p10)  ;;  %v964_v1 = vld [vmem:[#allocation9 + $0x10] sm:$0xff] (!%p2319_p10) }
 0x180   : > { %v4008_v63 = vadd.f32 %v739_v45, %v627_v39  ;;  %765 = vst [vmem:[#allocation3 + $0x38] sm:$0xff] %v4002_v9  ;;  %v2938_v57 = vpack.c.bf16 (!%p2319_p10), %v783_v42, %v782_v36  ;;  %v962_v39 = vld [vmem:[#allocation9] sm:$0xff] (!%p2319_p10)  ;;  %v965_v43 = vld [vmem:[#allocation9 + $0x18] sm:$0xff] (!%p2319_p10)  ;;  %v2942_v41 = vpack.c.bf16 (!%p2319_p10), %v785_v62, %v784_v48  ;;  %v787_v44 = vld [vmem:[#allocation7 + $0x48] sm:$0xff] (!%p2319_p10) }
 0x181   : > { %773 = vst [vmem:[#allocation3 + $0x78] sm:$0xff] %v4004_v35  ;;  %764 = vst [vmem:[#allocation3 + $0x30] sm:$0xff] %v4006_v58  ;;  %2931 = vmatprep.subr.bf16.mxu0 (!%p2319_p10), %v2930_v12  ;;  %v2962_v56 = vpack.c.bf16 (!%p2319_p10), %v963_v54, %v962_v39  ;;  %v2966_v45 = vpack.c.bf16 (!%p2319_p10), %v965_v43, %v964_v1  ;;  %v786_v55 = vld [vmem:[#allocation7 + $0x40] sm:$0xff] (!%p2319_p10)  ;;  %v969_v38 = vld [vmem:[#allocation9 + $0x38] sm:$0xff] (!%p2319_p10) }
 0x182   : > { %772 = vst [vmem:[#allocation3 + $0x70] sm:$0xff] %v4008_v63  ;;  %2933 = vmatpush3.bf16.msra.mxu0 (!%p2319_p10), %v2930_v12  ;;  %v968_v12 = vld [vmem:[#allocation9 + $0x30] sm:$0xff] (!%p2319_p10)  ;;  %v2946_v36 = vpack.c.bf16 (!%p2319_p10), %v787_v44, %v786_v55  ;;  %v789_v39 = vld [vmem:[#allocation7 + $0x58] sm:$0xff] (!%p2319_p10)  ;;  %v970_v1 = vld [vmem:[#allocation9 + $0x40] sm:$0xff] (!%p2319_p10) }
 0x183   : > { %2935 = vmatprep.subr.bf16.mxu0 %v2934_v50  ;;  %2963 = vmatprep.subr.bf16.mxu1 %v2962_v56  ;;  %v788_v42 = vld [vmem:[#allocation7 + $0x50] sm:$0xff]  ;;  %v2974_v54 = vpack.c.bf16 %v969_v38, %v968_v12  ;;  %v790_v62 = vld [vmem:[#allocation7 + $0x60] sm:$0xff]  ;;  %v973_v43 = vld [vmem:[#allocation9 + $0x58] sm:$0xff] }
 0x184   : > { %2965 = vmatpush3.bf16.msra.mxu1 %v2962_v56  ;;  %v2950_v48 = vpack.c.bf16 %v789_v39, %v788_v42  ;;  %v791_v56 = vld [vmem:[#allocation7 + $0x68] sm:$0xff]  ;;  %v972_v14 = vld [vmem:[#allocation9 + $0x50] sm:$0xff]  ;;  %v793_v55 = vld [vmem:[#allocation7 + $0x78] sm:$0xff] }
 0x185   : > { %2967 = vmatprep.subr.bf16.mxu1 %v2966_v45  ;;  %v2982_v44 = vpack.c.bf16 %v973_v43, %v972_v14  ;;  %v974_v12 = vld [vmem:[#allocation9 + $0x60] sm:$0xff]  ;;  %v975_v38 = vld [vmem:[#allocation9 + $0x68] sm:$0xff] }
 0x186   : > { %2937 = vmatpush3.bf16.msra.mxu0 %v2934_v50  ;;  %v971_v50 = vld [vmem:[#allocation9 + $0x48] sm:$0xff] }
 0x187   : > { %2939 = vmatprep.subr.bf16.mxu0 %v2938_v57  ;;  %v2978_v6 = vpack.c.bf16 %v971_v50, %v970_v1 }
 0x188   : > { %2969 = vmatpush3.bf16.msra.mxu1 %v2966_v45  ;;  %v792_v45 = vld [vmem:[#allocation7 + $0x70] sm:$0xff] }
 0x189   : > { %2971 = vmatprep.subr.bf16.mxu1 %v2970_v37 }
 0x18a   : > { %2941 = vmatpush3.bf16.msra.mxu0 %v2938_v57  ;;  %v2954_v57 = vpack.c.bf16 %v791_v56, %v790_v62 }
 0x18b   : > { %2943 = vmatprep.subr.bf16.mxu0 %v2942_v41 }
 0x18c   : > { %2973 = vmatpush3.bf16.msra.mxu1 %v2970_v37  ;;  %v2986_v37 = vpack.c.bf16 %v975_v38, %v974_v12 }
 0x18d   : > { %2975 = vmatprep.subr.bf16.mxu1 %v2974_v54 }
 0x18e   : > { %2945 = vmatpush3.bf16.msra.mxu0 %v2942_v41  ;;  %v2958_v41 = vpack.c.bf16 %v793_v55, %v792_v45 }
 0x18f   : > { %2947 = vmatprep.subr.bf16.mxu0 %v2946_v36 }
 0x190   : > { %2977 = vmatpush3.bf16.msra.mxu1 %v2974_v54 }
 0x191   : > { %2979 = vmatprep.subr.bf16.mxu1 %v2978_v6 }
 0x192   : > { %2949 = vmatpush3.bf16.msra.mxu0 %v2946_v36 }
 0x193   : > { %2951 = vmatprep.subr.bf16.mxu0 %v2950_v48 }
 0x194   : > { %2981 = vmatpush3.bf16.msra.mxu1 %v2978_v6 }
 0x195   : > { %2983 = vmatprep.subr.bf16.mxu1 %v2982_v44 }
 0x196   : > { %2953 = vmatpush3.bf16.msra.mxu0 %v2950_v48 }
 0x197   : > { %2955 = vmatprep.subr.bf16.mxu0 %v2954_v57 }
 0x198   : > { %2985 = vmatpush3.bf16.msra.mxu1 %v2982_v44 }
 0x199   : > { %2987 = vmatprep.subr.bf16.mxu1 %v2986_v37 }
 0x19a   : > { %2957 = vmatpush3.bf16.msra.mxu0 %v2954_v57 }
 0x19b   : > { %2959 = vmatprep.subr.bf16.mxu0 %v2958_v41 }
 0x19c   : > { %2989 = vmatpush3.bf16.msra.mxu1 %v2986_v37 }
 0x19e   : > { %2961 = vmatpush3.bf16.msra.mxu0 %v2958_v41 }
 0x1a1   : > { %2651 = vmatmul.mubr.f32.vlgmr.msra.gmra.mrb[0].mxu0 %v3952_v46  ;;  %v976_v46 = vld [vmem:[#allocation9 + $0x70] sm:$0xff] }
 0x1a2   : > { %2653 = vmatprep.mubr.f32.mxu0 %v3974_v61 }
 0x1a5   : > { %2654 = vmatmul.mubr.f32.gmra.mrb[2].mxu0 %v3968_v49  ;;  %v977_v49 = vld [vmem:[#allocation9 + $0x78] sm:$0xff] }
 0x1a6   : > { %2656 = vmatprep.mubr.f32.mxu0 %v3990_v59  ;;  %v2990_v61 = vpack.c.bf16 %v977_v49, %v976_v46 }
 0x1a8   : > { %2991 = vmatprep.subr.bf16.mxu1 %v2990_v61 }
 0x1a9   : > { %2657 = vmatmul.mubr.f32.gmra.mrb[4].mxu0 %v3984_v51  ;;  %2993 = vmatpush3.bf16.msra.mxu1 %v2990_v61 }
 0x1aa   : > { %2659 = vmatprep.mubr.f32.mxu0 %v4006_v58 }
 0x1ad   : > { %2660 = vmatmul.mubr.f32.gmra.mrb[6].mxu0 %v4002_v9 }
 0x1ae   : > { %2662 = vmatprep.mubr.f32.mxu0 %v3960_v0  ;;  %v2320_v0 = vld [vmem:[%s4467_s4] ss:$0 sm:$0xff] }
 0x1b1   : > { %2663 = vmatmul.mubr.f32.gmra.mrb[8].mxu0 %v3954_v34 }
 0x1b2   : > { %2665 = vmatprep.mubr.f32.mxu0 %v3976_v60 }
 0x1b5   : > { %2666 = vmatmul.mubr.f32.gmra.mrb[10].mxu0 %v3970_v52 }
 0x1b6   : > { %2668 = vmatprep.mubr.f32.mxu0 %v3992_v47 }
 0x1b9   : > { %2669 = vmatmul.mubr.f32.gmra.mrb[12].mxu0 %v3986_v53 }
 0x1ba   : > { %2671 = vmatprep.mubr.f32.mxu0 %v4008_v63 }
 0x1bd   : > { %2672 = vmatmul.mubr.f32.gmra.mrb[14].mxu0 %v4004_v35 }
 0x274   : > { %v2652_v34 = vpop.f32.mrb[0].mxu0 }
 0x275   : > { %v873_v60 = vadd.f32 %v2652_v34, %v2320_v0  ;;  %v867_v52 = vpop.f32.mrb[1].mxu0 }
 0x276   : > { %v868_v51 = vadd.f32 %v2320_v0, %v867_v52 }
 0x277   : > { %v947_v53 = vmax.f32 %v873_v60, 0.0 }
 0x278   : > { %v2655_v59 = vpop.f32.mrb[2].mxu0  ;;  %v946_v47 = vmax.f32 %v868_v51, 0.0 }
 0x279   : > { %v883_v9 = vadd.f32 %v2655_v59, %v2320_v0  ;;  %v877_v58 = vpop.f32.mrb[3].mxu0 }
 0x27a   : > { %v878_v63 = vadd.f32 %v2320_v0, %v877_v58  ;;  %2706 = vmatprep.mubr.f32.mxu1 %v946_v47 }
 0x27b   : > { %2707 = vmatmul.mubr.f32.vlgmr.msra.gmra.mrb[0].mxu1 %v947_v53  ;;  %v949_v42 = vmax.f32 %v883_v9, 0.0 }
 0x27c   : > { %v948_v35 = vmax.f32 %v878_v63, 0.0  ;;  %v2658_v36 = vpop.f32.mrb[4].mxu0 }
 0x27d   : > { %v893_v39 = vadd.f32 %v2658_v36, %v2320_v0  ;;  %v887_v54 = vpop.f32.mrb[5].mxu0 }
 0x27e   : > { %v888_v1 = vadd.f32 %v2320_v0, %v887_v54  ;;  %2709 = vmatprep.mubr.f32.mxu1 %v948_v35  ;;  %v1130_v54 = vlaneseq }
 0x27f   : > { %v951_v50 = vmax.f32 %v893_v39, 0.0  ;;  %2710 = vmatmul.mubr.f32.gmra.mrb[2].mxu1 %v949_v42 }
 0x280   : > { %v950_v48 = vmax.f32 %v888_v1, 0.0  ;;  %v2661_v62 = vpop.f32.mrb[6].mxu0  ;;  %v4034_v1 = vand.u32 127, %v1130_v54 }
 0x281   : > { %v903_v56 = vadd.f32 %v2661_v62, %v2320_v0  ;;  %v897_v6 = vpop.f32.mrb[7].mxu0 }
 0x282   : > { %v898_v14 = vadd.f32 %v2320_v0, %v897_v6  ;;  %2712 = vmatprep.mubr.f32.mxu1 %v950_v48  ;;  %vm1132_vm0 = vcmp.lt.s32.totalorder %v4034_v1, 4 }
 0x283   : > { %v953_v43 = vmax.f32 %v903_v56, 0.0  ;;  %2713 = vmatmul.mubr.f32.gmra.mrb[4].mxu1 %v951_v50  ;;  %v2321_v50 = vld [vmem:[%s4469_s6] ss:$0 sm:$0xff] }
 0x284   : > { %v952_v57 = vmax.f32 %v898_v14, 0.0  ;;  %v2664_v45 = vpop.f32.mrb[8].mxu0 }
 0x285   : > { %v913_v55 = vadd.f32 %v2664_v45, %v2320_v0  ;;  %v907_v44 = vpop.f32.mrb[9].mxu0 }
 0x286   : > { %v908_v12 = vadd.f32 %v2320_v0, %v907_v44  ;;  %2715 = vmatprep.mubr.f32.mxu1 %v952_v57 }
 0x287   : > { %v955_v38 = vmax.f32 %v913_v55, 0.0  ;;  %2716 = vmatmul.mubr.f32.gmra.mrb[6].mxu1 %v953_v43 }
 0x288   : > { %v954_v41 = vmax.f32 %v908_v12, 0.0  ;;  %v2667_v37 = vpop.f32.mrb[10].mxu0 }
 0x289   : > { %v923_v46 = vadd.f32 %v2667_v37, %v2320_v0  ;;  %v917_v49 = vpop.f32.mrb[11].mxu0 }
 0x28a   : > { %v918_v61 = vadd.f32 %v2320_v0, %v917_v49  ;;  %2718 = vmatprep.mubr.f32.mxu1 %v954_v41 }
 0x28b   : > { %v957_v34 = vmax.f32 %v923_v46, 0.0  ;;  %2719 = vmatmul.mubr.f32.gmra.mrb[8].mxu1 %v955_v38 }
 0x28c   : > { %v956_v60 = vmax.f32 %v918_v61, 0.0  ;;  %v2670_v52 = vpop.f32.mrb[12].mxu0 }
 0x28d   : > { %v933_v51 = vadd.f32 %v2670_v52, %v2320_v0  ;;  %v927_v59 = vpop.f32.mrb[13].mxu0 }
 0x28e   : > { %v928_v47 = vadd.f32 %v2320_v0, %v927_v59  ;;  %2721 = vmatprep.mubr.f32.mxu1 %v956_v60 }
 0x28f   : > { %v959_v53 = vmax.f32 %v933_v51, 0.0  ;;  %2722 = vmatmul.mubr.f32.gmra.mrb[10].mxu1 %v957_v34 }
 0x290   : > { %v958_v9 = vmax.f32 %v928_v47, 0.0  ;;  %v2673_v58 = vpop.f32.mrb[14].mxu0 }
 0x291   : > { %v943_v63 = vadd.f32 %v2673_v58, %v2320_v0  ;;  %v937_v35 = vpop.f32.mrb[15].mxu0 }
 0x292   : > { %v938_v36 = vadd.f32 %v2320_v0, %v937_v35  ;;  %2724 = vmatprep.mubr.f32.mxu1 %v958_v9 }
 0x293   : > { %v961_v42 = vmax.f32 %v943_v63, 0.0  ;;  %2725 = vmatmul.mubr.f32.gmra.mrb[12].mxu1 %v959_v53 }
 0x294   : > { %v960_v39 = vmax.f32 %v938_v36, 0.0 }
 0x296   : > { %2727 = vmatprep.mubr.f32.mxu1 %v960_v39 }
 0x297   : > { %2728 = vmatmul.mubr.f32.gmra.mrb[14].mxu1 %v961_v42 }
 0x34e   : > { %v2708_v48 = vpop.f32.mrb[0].mxu1 }
 0x34f   : > { %v1057_v62 = vadd.f32 %v2708_v48, %v2321_v50  ;;  %v1051_v56 = vpop.f32.mrb[1].mxu1 }
 0x350   : > { %v1052_v6 = vadd.f32 %v2321_v50, %v1051_v56 }
 0x351   : > { %v1134_v0 = vsel %vm1132_vm0, %v1057_v62, -1e+30 }
 0x352   : > { %1151 = vmax.xlane.f32.xlu0 %v1134_v0  ;;  %v2711_v14 = vpop.f32.mrb[2].mxu1  ;;  %v1133_v44 = vsel %vm1132_vm0, %v1052_v6, -1e+30 }
 0x353   : > { %v1067_v43 = vadd.f32 %v2711_v14, %v2321_v50  ;;  %v1061_v57 = vpop.f32.mrb[3].mxu1 }
 0x354   : > { %v1062_v45 = vadd.f32 %v2321_v50, %v1061_v57 }
 0x355   : > { %v1136_v55 = vsel %vm1132_vm0, %v1067_v43, -1e+30 }
 0x356   : > { %1155 = vmax.xlane.f32.xlu1 %v1136_v55  ;;  %v2714_v12 = vpop.f32.mrb[4].mxu1  ;;  %1149 = vmax.xlane.f32.xlu0 %v1133_v44  ;;  %v1135_v46 = vsel %vm1132_vm0, %v1062_v45, -1e+30 }
 0x357   : > { %v1071_v38 = vpop.f32.mrb[5].mxu1  ;;  %v1077_v37 = vadd.f32 %v2714_v12, %v2321_v50 }
 0x358   : > { %v1072_v41 = vadd.f32 %v2321_v50, %v1071_v38 }
 0x359   : > { %v1138_v51 = vsel %vm1132_vm0, %v1077_v37, -1e+30 }
 0x35a   : > { %v2717_v49 = vpop.f32.mrb[6].mxu1  ;;  %1153 = vmax.xlane.f32.xlu1 %v1135_v46  ;;  %v1137_v61 = vsel %vm1132_vm0, %v1072_v41, -1e+30 }
 0x35b   : > { %v1081_v34 = vpop.f32.mrb[7].mxu1  ;;  %1157 = vmax.xlane.f32.xlu0 %v1137_v61  ;;  %v1087_v52 = vadd.f32 %v2717_v49, %v2321_v50 }
 0x35c   : > { %v1082_v60 = vadd.f32 %v2321_v50, %v1081_v34 }
 0x35d   : > { %v1140_v63 = vsel %vm1132_vm0, %v1087_v52, -1e+30 }
 0x35e   : > { %v2720_v59 = vpop.f32.mrb[8].mxu1  ;;  %1159 = vmax.xlane.f32.xlu1 %v1138_v51  ;;  %v1139_v47 = vsel %vm1132_vm0, %v1082_v60, -1e+30 }
 0x35f   : > { %v1091_v53 = vpop.f32.mrb[9].mxu1  ;;  %1161 = vmax.xlane.f32.xlu0 %v1139_v47  ;;  %v1097_v58 = vadd.f32 %v2720_v59, %v2321_v50 }
 0x360   : > { %v1092_v9 = vadd.f32 %v2321_v50, %v1091_v53 }
 0x361   : > { %v1142_v48 = vsel %vm1132_vm0, %v1097_v58, -1e+30 }
 0x362   : > { %v2723_v35 = vpop.f32.mrb[10].mxu1  ;;  %1163 = vmax.xlane.f32.xlu1 %v1140_v63  ;;  %v1141_v36 = vsel %vm1132_vm0, %v1092_v9, -1e+30 }
 0x363   : > { %v1101_v42 = vpop.f32.mrb[11].mxu1  ;;  %1165 = vmax.xlane.f32.xlu0 %v1141_v36  ;;  %v1107_v54 = vadd.f32 %v2723_v35, %v2321_v50 }
 0x364   : > { %v1102_v39 = vadd.f32 %v2321_v50, %v1101_v42 }
 0x365   : > { %v4067_v57 = vsel %vm1132_vm0, %v1107_v54, -1e+30 }
 0x366   : > { %v2726_v62 = vpop.f32.mrb[12].mxu1  ;;  %1167 = vmax.xlane.f32.xlu1 %v1142_v48  ;;  %v4062_v56 = vsel %vm1132_vm0, %v1102_v39, -1e+30 }
 0x367   : > { %v1111_v6 = vpop.f32.mrb[13].mxu1  ;;  %1169 = vmax.xlane.f32.xlu0 %v4062_v56  ;;  %v1117_v43 = vadd.f32 %v2726_v62, %v2321_v50 }
 0x368   : > { %v1112_v14 = vadd.f32 %v2321_v50, %v1111_v6 }
 0x369   : > { %v4077_v49 = vsel %vm1132_vm0, %v1117_v43, -1e+30 }
 0x36a   : > { %v2729_v45 = vpop.f32.mrb[14].mxu1  ;;  %1171 = vmax.xlane.f32.xlu1 %v4067_v57  ;;  %v4072_v12 = vsel %vm1132_vm0, %v1112_v14, -1e+30 }
 0x36b   : > { %v1121_v38 = vpop.f32.mrb[15].mxu1  ;;  %1173 = vmax.xlane.f32.xlu0 %v4072_v12  ;;  %v1127_v37 = vadd.f32 %v2729_v45, %v2321_v50 }
 0x36c   : > { %v1122_v41 = vadd.f32 %v2321_v50, %v1121_v38 }
 0x36d   : > { %v4087_v60 = vsel %vm1132_vm0, %v1127_v37, -1e+30 }
 0x36e   : > { %1175 = vmax.xlane.f32.xlu1 %v4077_v49  ;;  %v4082_v34 = vsel %vm1132_vm0, %v1122_v41, -1e+30 }
 0x36f   : > { %1177 = vmax.xlane.f32.xlu0 %v4082_v34 }
 0x372   : > { %1179 = vmax.xlane.f32.xlu1 %v4087_v60 }
 0x3df   : > { %v1152_v52 = vpop.xlane.xlu0 %1151 }
 0x3e0   : > { %v4090_v50 = vsub.f32 %v1134_v0, %v1152_v52 }
 0x3e2   : > { %v1199_v59 = vmul.f32 1.442695, %v4090_v50 }
 0x3e3   : > { %v1156_v53 = vpop.xlane.xlu1 %1155  ;;  %v1150_v9 = vpop.xlane.xlu0 %1149 }
 0x3e4   : > { %3194 = vpow2.f32 %v1199_v59  ;;  %v4093_v58 = vsub.f32 %v1136_v55, %v1156_v53  ;;  %v4095_v35 = vsub.f32 %v1133_v44, %v1150_v9 }
 0x3e6   : > { %v1203_v42 = vmul.f32 1.442695, %v4093_v58  ;;  %v1197_v1 = vmul.f32 1.442695, %v4095_v35 }
 0x3e7   : > { %v1154_v39 = vpop.xlane.xlu1 %1153 }
 0x3e8   : > { %3196 = vpow2.f32 %v1203_v42  ;;  %v4099_v54 = vsub.f32 %v1135_v46, %v1154_v39  ;;  %v1158_v62 = vpop.xlane.xlu0 %1157 }
 0x3e9   : > { %3198 = vpow2.f32 %v1197_v1  ;;  %v4101_v0 = vsub.f32 %v1137_v61, %v1158_v62 }
 0x3ea   : > { %v1201_v6 = vmul.f32 1.442695, %v4099_v54 }
 0x3eb   : > { %v1160_v14 = vpop.xlane.xlu1 %1159  ;;  %v1205_v43 = vmul.f32 1.442695, %v4101_v0 }
 0x3ec   : > { %3200 = vpow2.f32 %v1201_v6  ;;  %v4104_v55 = vsub.f32 %v1138_v51, %v1160_v14  ;;  %v1162_v44 = vpop.xlane.xlu0 %1161 }
 0x3ed   : > { %v4107_v45 = vsub.f32 %v1139_v47, %v1162_v44 }
 0x3ee   : > { %v3195_v38 = vpop.eup %3194  ;;  %v1207_v41 = vmul.f32 1.442695, %v4104_v55 }
 0x3ef   : > { %1231 = vadd.xlane.f32.xlu1 %v3195_v38  ;;  %v1164_v46 = vpop.xlane.xlu1 %1163  ;;  %v1209_v52 = vmul.f32 1.442695, %v4107_v45 }
 0x3f0   : > { %3202 = vpow2.f32 %v1207_v41  ;;  %v4110_v37 = vsub.f32 %v1140_v63, %v1164_v46  ;;  %v1166_v61 = vpop.xlane.xlu0 %1165 }
 0x3f1   : > { %3204 = vpow2.f32 %v1205_v43  ;;  %v4113_v59 = vsub.f32 %v1141_v36, %v1166_v61 }
 0x3f2   : > { %v3197_v51 = vpop.eup %3196  ;;  %v1211_v53 = vmul.f32 1.442695, %v4110_v37 }
 0x3f3   : > { %v3199_v9 = vpop.eup %3198  ;;  %1235 = vadd.xlane.f32.xlu1 %v3197_v51  ;;  %v1168_v47 = vpop.xlane.xlu1 %1167  ;;  %v1213_v63 = vmul.f32 1.442695, %v4113_v59 }
 0x3f4   : > { %3206 = vpow2.f32 %v1211_v53  ;;  %v4116_v42 = vsub.f32 %v1142_v48, %v1168_v47  ;;  %1229 = vadd.xlane.f32.xlu0 %v3199_v9  ;;  %v1170_v1 = vpop.xlane.xlu0 %1169 }
 0x3f5   : > { %3208 = vpow2.f32 %v1209_v52  ;;  %v4120_v39 = vsub.f32 %v4062_v56, %v1170_v1 }
 0x3f6   : > { %v3201_v62 = vpop.eup %3200  ;;  %v1215_v36 = vmul.f32 1.442695, %v4116_v42 }
 0x3f7   : > { %v1172_v6 = vpop.xlane.xlu1 %1171  ;;  %v1217_v48 = vmul.f32 1.442695, %v4120_v39 }
 0x3f8   : > { %3210 = vpow2.f32 %v1215_v36  ;;  %v4124_v14 = vsub.f32 %v4067_v57, %v1172_v6  ;;  %1233 = vadd.xlane.f32.xlu0 %v3201_v62  ;;  %v1174_v44 = vpop.xlane.xlu0 %1173 }
 0x3f9   : > { %3212 = vpow2.f32 %v1213_v63  ;;  %v4128_v43 = vsub.f32 %v4072_v12, %v1174_v44 }
 0x3fa   : > { %v3203_v38 = vpop.eup %3202  ;;  %v1219_v56 = vmul.f32 1.442695, %v4124_v14 }
 0x3fb   : > { %v3205_v41 = vpop.eup %3204  ;;  %1239 = vadd.xlane.f32.xlu1 %v3203_v38  ;;  %v1176_v46 = vpop.xlane.xlu1 %1175  ;;  %v1221_v52 = vmul.f32 1.442695, %v4128_v43 }
 0x3fc   : > { %3214 = vpow2.f32 %v1219_v56  ;;  %v4132_v61 = vsub.f32 %v4077_v49, %v1176_v46  ;;  %1237 = vadd.xlane.f32.xlu0 %v3205_v41  ;;  %v1178_v57 = vpop.xlane.xlu0 %1177 }
 0x3fd   : > { %3216 = vpow2.f32 %v1217_v48  ;;  %v4136_v51 = vsub.f32 %v4082_v34, %v1178_v57 }
 0x3fe   : > { %v3207_v12 = vpop.eup %3206  ;;  %v1223_v53 = vmul.f32 1.442695, %v4132_v61 }
 0x3ff   : > { %v3209_v9 = vpop.eup %3208  ;;  %1243 = vadd.xlane.f32.xlu1 %v3207_v12  ;;  %v1180_v47 = vpop.xlane.xlu1 %1179  ;;  %v1225_v49 = vmul.f32 1.442695, %v4136_v51 }
 0x400   : > { %3218 = vpow2.f32 %v1223_v53  ;;  %v4140_v1 = vsub.f32 %v4087_v60, %v1180_v47  ;;  %1241 = vadd.xlane.f32.xlu0 %v3209_v9 }
 0x401   : > { %3220 = vpow2.f32 %v1221_v52 }
 0x402   : > { %v3211_v63 = vpop.eup %3210  ;;  %v1227_v62 = vmul.f32 1.442695, %v4140_v1 }
 0x403   : > { %v3213_v36 = vpop.eup %3212  ;;  %1247 = vadd.xlane.f32.xlu1 %v3211_v63 }
 0x404   : > { %3222 = vpow2.f32 %v1227_v62  ;;  %1245 = vadd.xlane.f32.xlu0 %v3213_v36 }
 0x405   : > { %3224 = vpow2.f32 %v1225_v49 }
 0x406   : > { %v3215_v34 = vpop.eup %3214 }
 0x407   : > { %v3217_v6 = vpop.eup %3216  ;;  %1251 = vadd.xlane.f32.xlu1 %v3215_v34 }
 0x408   : > { %1249 = vadd.xlane.f32.xlu0 %v3217_v6 }
 0x40a   : > { %v3219_v44 = vpop.eup %3218 }
 0x40b   : > { %v3221_v48 = vpop.eup %3220  ;;  %1255 = vadd.xlane.f32.xlu1 %v3219_v44 }
 0x40c   : > { %1253 = vadd.xlane.f32.xlu0 %v3221_v48 }
 0x40e   : > { %v3223_v60 = vpop.eup %3222 }
 0x40f   : > { %v3225_v38 = vpop.eup %3224  ;;  %1259 = vadd.xlane.f32.xlu1 %v3223_v60 }
 0x410   : > { %1257 = vadd.xlane.f32.xlu0 %v3225_v38 }
 0x47c   : > { %v1232_v56 = vpop.xlane.xlu1 %1231 }
 0x47d   : > { %3226 = vlog2.f32 %v1232_v56 }
 0x480   : > { %v1236_v41 = vpop.xlane.xlu1 %1235 }
 0x481   : > { %3228 = vlog2.f32 %v1236_v41  ;;  %v1230_v46 = vpop.xlane.xlu0 %1229 }
 0x482   : > { %3230 = vlog2.f32 %v1230_v46 }
 0x485   : > { %v1234_v57 = vpop.xlane.xlu0 %1233 }
 0x486   : > { %3232 = vlog2.f32 %v1234_v57 }
 0x487   : > { %v3227_v52 = vpop.eup %3226 }
 0x488   : > { %v1264_v12 = vmul.f32 0.6931472, %v3227_v52  ;;  %v1240_v53 = vpop.xlane.xlu1 %1239 }
 0x489   : > { %3234 = vlog2.f32 %v1240_v53  ;;  %v1238_v9 = vpop.xlane.xlu0 %1237 }
 0x48a   : > { %v1294_v47 = vsub.f32 %v4090_v50, %v1264_v12  ;;  %3236 = vlog2.f32 %v1238_v9 }
 0x48b   : > { %v3229_v49 = vpop.eup %3228 }
 0x48c   : > { %v3231_v63 = vpop.eup %3230  ;;  %1311 = vst [vmem:[#allocation10 + $0x8] sm:$0xff] %v1294_v47  ;;  %v1268_v62 = vmul.f32 0.6931472, %v3229_v49  ;;  %v1244_v36 = vpop.xlane.xlu1 %1243 }
 0x48d   : > { %v1262_v34 = vmul.f32 0.6931472, %v3231_v63  ;;  %3238 = vlog2.f32 %v1244_v36  ;;  %v1242_v6 = vpop.xlane.xlu0 %1241 }
 0x48e   : > { %v1296_v44 = vsub.f32 %v4093_v58, %v1268_v62  ;;  %3240 = vlog2.f32 %v1242_v6 }
 0x48f   : > { %v1293_v48 = vsub.f32 %v4095_v35, %v1262_v34 }
 0x490   : > { %v3233_v60 = vpop.eup %3232  ;;  %1313 = vst [vmem:[#allocation10 + $0x18] sm:$0xff] %v1296_v44  ;;  %v1248_v38 = vpop.xlane.xlu1 %1247 }
 0x491   : > { %1310 = vst [vmem:[#allocation10] sm:$0xff] %v1293_v48  ;;  %v1266_v56 = vmul.f32 0.6931472, %v3233_v60  ;;  %3242 = vlog2.f32 %v1248_v38  ;;  %v1246_v50 = vpop.xlane.xlu0 %1245 }
 0x492   : > { %3244 = vlog2.f32 %v1246_v50 }
 0x493   : > { %v3235_v41 = vpop.eup %3234  ;;  %v1295_v46 = vsub.f32 %v4099_v54, %v1266_v56 }
 0x494   : > { %v3237_v57 = vpop.eup %3236  ;;  %v1272_v52 = vmul.f32 0.6931472, %v3235_v41  ;;  %v1252_v12 = vpop.xlane.xlu1 %1251 }
 0x495   : > { %1312 = vst [vmem:[#allocation10 + $0x10] sm:$0xff] %v1295_v46  ;;  %v1270_v53 = vmul.f32 0.6931472, %v3237_v57  ;;  %3246 = vlog2.f32 %v1252_v12  ;;  %v1250_v58 = vpop.xlane.xlu0 %1249 }
 0x496   : > { %v1298_v35 = vsub.f32 %v4104_v55, %v1272_v52  ;;  %3248 = vlog2.f32 %v1250_v58 }
 0x497   : > { %v3239_v9 = vpop.eup %3238  ;;  %v1297_v47 = vsub.f32 %v4101_v0, %v1270_v53 }
 0x498   : > { %v3241_v49 = vpop.eup %3240  ;;  %1315 = vst [vmem:[#allocation10 + $0x28] sm:$0xff] %v1298_v35  ;;  %v1276_v63 = vmul.f32 0.6931472, %v3239_v9  ;;  %v1256_v62 = vpop.xlane.xlu1 %1255 }
 0x499   : > { %1314 = vst [vmem:[#allocation10 + $0x20] sm:$0xff] %v1297_v47  ;;  %v1274_v36 = vmul.f32 0.6931472, %v3241_v49  ;;  %3250 = vlog2.f32 %v1256_v62  ;;  %v1254_v54 = vpop.xlane.xlu0 %1253 }
 0x49a   : > { %v1300_v34 = vsub.f32 %v4110_v37, %v1276_v63  ;;  %3252 = vlog2.f32 %v1254_v54 }
 0x49b   : > { %v3243_v6 = vpop.eup %3242  ;;  %v1299_v44 = vsub.f32 %v4107_v45, %v1274_v36 }
 0x49c   : > { %v3245_v48 = vpop.eup %3244  ;;  %1317 = vst [vmem:[#allocation10 + $0x38] sm:$0xff] %v1300_v34  ;;  %v1280_v55 = vmul.f32 0.6931472, %v3243_v6  ;;  %v1260_v60 = vpop.xlane.xlu1 %1259 }
 0x49d   : > { %1316 = vst [vmem:[#allocation10 + $0x30] sm:$0xff] %v1299_v44  ;;  %v1278_v0 = vmul.f32 0.6931472, %v3245_v48  ;;  %3254 = vlog2.f32 %v1260_v60  ;;  %v1258_v38 = vpop.xlane.xlu0 %1257 }
 0x49e   : > { %v1302_v56 = vsub.f32 %v4116_v42, %v1280_v55  ;;  %3256 = vlog2.f32 %v1258_v38 }
 0x49f   : > { %v3247_v50 = vpop.eup %3246  ;;  %v1301_v41 = vsub.f32 %v4113_v59, %v1278_v0 }
 0x4a0   : > { %v3249_v46 = vpop.eup %3248  ;;  %1319 = vst [vmem:[#allocation10 + $0x48] sm:$0xff] %v1302_v56  ;;  %v1284_v37 = vmul.f32 0.6931472, %v3247_v50 }
 0x4a1   : > { %1318 = vst [vmem:[#allocation10 + $0x40] sm:$0xff] %v1301_v41  ;;  %v1282_v57 = vmul.f32 0.6931472, %v3249_v46 }
 0x4a2   : > { %v1304_v45 = vsub.f32 %v4124_v14, %v1284_v37 }
 0x4a3   : > { %v3251_v52 = vpop.eup %3250  ;;  %v1303_v12 = vsub.f32 %v4120_v39, %v1282_v57 }
 0x4a4   : > { %v3253_v53 = vpop.eup %3252  ;;  %1321 = vst [vmem:[#allocation10 + $0x58] sm:$0xff] %v1304_v45  ;;  %v1288_v58 = vmul.f32 0.6931472, %v3251_v52 }
 0x4a5   : > { %1320 = vst [vmem:[#allocation10 + $0x50] sm:$0xff] %v1303_v12  ;;  %v1286_v35 = vmul.f32 0.6931472, %v3253_v53 }
 0x4a6   : > { %v1306_v42 = vsub.f32 %v4132_v61, %v1288_v58 }
 0x4a7   : > { %v3255_v9 = vpop.eup %3254  ;;  %v1305_v59 = vsub.f32 %v4128_v43, %v1286_v35 }
 0x4a8   : > { %v3257_v47 = vpop.eup %3256  ;;  %1323 = vst [vmem:[#allocation10 + $0x68] sm:$0xff] %v1306_v42  ;;  %v1292_v49 = vmul.f32 0.6931472, %v3255_v9 }
 0x4a9   : > { %1322 = vst [vmem:[#allocation10 + $0x60] sm:$0xff] %v1305_v59  ;;  %v1290_v63 = vmul.f32 0.6931472, %v3257_v47 }
 0x4aa   : > { %v1308_v14 = vsub.f32 %v4140_v1, %v1292_v49 }
 0x4ab   : > { %v1307_v62 = vsub.f32 %v4136_v51, %v1290_v63 }
 0x4ac   : > { %1325 = vst [vmem:[#allocation10 + $0x78] sm:$0xff] %v1308_v14 }
 0x4ad   : > { %1324 = vst [vmem:[#allocation10 + $0x70] sm:$0xff] %v1307_v62 }
 0x4ae PF: > { %p2322_p11 = scmp.ne.s32.totalorder %s447_s19, 1 }
 0x4af   : > { %v1330_v39 = vld [vmem:[#allocation3] sm:$0xff] (!%p2322_p11)  ;;  %v1331_v61 = vld [vmem:[#allocation3 + $0x8] sm:$0xff] (!%p2322_p11)  ;;  %v1332_v43 = vld [vmem:[#allocation3 + $0x10] sm:$0xff] (!%p2322_p11)  ;;  %v4527_v36 = vunpack.c.l.bf16 (!%p2322_p11), %v3861_v32  ;;  %v4528_v54 = vunpack.c.l.bf16 (!%p2322_p11), %v3874_v40  ;;  %v1509_v1 = vmul.f32 (!%p2322_p11), 0.95, %v3744_v18  ;;  %v3478_v6 = vmov (!%p2322_p11), 0  }
 0x4b0   : > { %1329 = sbr.rel (%p2322_p11) target bundleno = 2275 (0x8e3), region = 76  ;;  %v2994_v51 = vpack.c.bf16 (!%p2322_p11), %v1331_v61, %v1330_v39  ;;  %v1333_v34 = vld [vmem:[#allocation3 + $0x18] sm:$0xff] (!%p2322_p11)  ;;  %3259 = vset.pattern.permute.xlu1 (!%p2322_p11), %v3478_v6  ;;  %3258 = vset.pattern.permute.xlu0 (!%p2322_p11), %v3478_v6  ;;  %v1334_v48 = vld [vmem:[#allocation3 + $0x20] sm:$0xff] (!%p2322_p11)  ;;  %v1335_v55 = vld [vmem:[#allocation3 + $0x28] sm:$0xff] (!%p2322_p11)  ;;  %v1507_v60 = vmul.f32 (!%p2322_p11), 0.95, %v3734_v16  ;;  %v4530_v49 = vunpack.c.h.bf16 (!%p2322_p11), %v3874_v40  ;;  %v4534_v14 = vunpack.c.h.bf16 (!%p2322_p11), %v3863_v33 }
 0x4b1   : > { %2762 = vmatprep.mubr.f32.mxu0 (!%p2322_p11), %v4527_v36  ;;  %2774 = vmatprep.mubr.f32.mxu1 (!%p2322_p11), %v4528_v54  ;;  %v2998_v44 = vpack.c.bf16 (!%p2322_p11), %v1333_v34, %v1332_v43  ;;  %v1510_v0 = vmul.f32 (!%p2322_p11), 0.95, %v3749_v19  ;;  %v3002_v18 = vpack.c.bf16 (!%p2322_p11), %v1335_v55, %v1334_v48  ;;  %v1508_v50 = vmul.f32 (!%p2322_p11), 0.95, %v3739_v17  ;;  %v1338_v19 = vld [vmem:[#allocation3 + $0x40] sm:$0xff] (!%p2322_p11)  ;;  %v1339_v46 = vld [vmem:[#allocation3 + $0x48] sm:$0xff] (!%p2322_p11) }
 0x4b2   : > { %1535 = vperm.xlu1 (!%p2322_p11), %3259, %v1509_v1   ;;  %2995 = vmatprep.subr.bf16.mxu0 (!%p2322_p11), %v2994_v51  ;;  %v1337_v56 = vld [vmem:[#allocation3 + $0x38] sm:$0xff] (!%p2322_p11)  ;;  %v1512_v41 = vmul.f32 (!%p2322_p11), 0.95, %v3759_v21  ;;  %v1511_v37 = vmul.f32 (!%p2322_p11), 0.95, %v3754_v20  ;;  %v3010_v17 = vpack.c.bf16 (!%p2322_p11), %v1339_v46, %v1338_v19  ;;  %v1340_v45 = vld [vmem:[#allocation3 + $0x50] sm:$0xff] (!%p2322_p11) }
 0x4b3   : > { %3106 = vmatprep.subr.bf16.mxu1 (!%p2322_p11), %v2994_v51  ;;  %2997 = vmatpush3.bf16.msra.mxu0 (!%p2322_p11), %v2994_v51  ;;  %v1336_v38 = vld [vmem:[#allocation3 + $0x30] sm:$0xff] (!%p2322_p11)  ;;  %v1514_v57 = vmul.f32 (!%p2322_p11), 0.95, %v3769_v23  ;;  %v1341_v21 = vld [vmem:[#allocation3 + $0x58] sm:$0xff] (!%p2322_p11)  ;;  %v1513_v52 = vmul.f32 (!%p2322_p11), 0.95, %v3764_v22 }
 0x4b4   : > { %3114 = vmatpush3.bf16.msra.mxu1 (!%p2322_p11), %v2994_v51  ;;  %2999 = vmatprep.subr.bf16.mxu0 (!%p2322_p11), %v2998_v44  ;;  %v3006_v16 = vpack.c.bf16 (!%p2322_p11), %v1337_v56, %v1336_v38  ;;  %v1516_v12 = vmul.f32 (!%p2322_p11), 0.95, %v3779_v25  ;;  %v3014_v20 = vpack.c.bf16 (!%p2322_p11), %v1341_v21, %v1340_v45  ;;  %v1342_v53 = vld [vmem:[#allocation3 + $0x60] sm:$0xff] (!%p2322_p11)  ;;  %v1343_v23 = vld [vmem:[#allocation3 + $0x68] sm:$0xff] (!%p2322_p11)  ;;  %v1515_v58 = vmul.f32 (!%p2322_p11), 0.95, %v3774_v24 }
 0x4b5   : > { %3107 = vmatprep.subr.bf16.mxu1 (!%p2322_p11), %v2998_v44  ;;  %1525 = vperm.xlu0 (!%p2322_p11), %3258, %v1507_v60   ;;  %v1518_v35 = vmul.f32 (!%p2322_p11), 0.95, %v3789_v27  ;;  %v3018_v22 = vpack.c.bf16 (!%p2322_p11), %v1343_v23, %v1342_v53  ;;  %v1344_v42 = vld [vmem:[#allocation3 + $0x70] sm:$0xff] (!%p2322_p11)  ;;  %v1345_v25 = vld [vmem:[#allocation3 + $0x78] sm:$0xff] (!%p2322_p11)  ;;  %v1517_v9 = vmul.f32 (!%p2322_p11), 0.95, %v3784_v26 }
 0x4b6   : > { %1540 = vperm.xlu1 (!%p2322_p11), %3259, %v1510_v0   ;;  %v1520_v59 = vmul.f32 (!%p2322_p11), 0.95, %v3799_v29  ;;  %v3022_v24 = vpack.c.bf16 (!%p2322_p11), %v1345_v25, %v1344_v42  ;;  %v1519_v27 = vmul.f32 (!%p2322_p11), 0.95, %v3794_v28  ;;  %v1522_v47 = vmul.f32 (!%p2322_p11), 0.95, %v3809_v31 }
 0x4b7   : > { %3001 = vmatpush3.bf16.msra.mxu0 %v2998_v44  ;;  %v1521_v26 = vmul.f32 0.95, %v3804_v30  ;;  %v4529_v29 = vunpack.c.h.bf16 %v3861_v32  ;;  %v4531_v28 = vunpack.c.l.bf16 %v3863_v33  ;;  %v4532_v31 = vld [vmem:[#allocation22_spill] sm:$0xff]  ;;  %v4536_v62 = vld [vmem:[#allocation20_spill] sm:$0xff]  ;;  %v4538_v32 = vld [vmem:[#allocation23_spill] sm:$0xff]  ;;  %p2323_p12 = scmp.ne.s32.totalorder %s3460_s24, 9 }
 0x4b8   : > { %3115 = vmatpush3.bf16.msra.mxu1 %v2998_v44  ;;  %3003 = vmatprep.subr.bf16.mxu0 %v3002_v18  ;;  %v4533_v63 = vunpack.c.l.bf16 %v4532_v31  ;;  %v4535_v30 = vunpack.c.h.bf16 %v4532_v31  ;;  %v4537_v39 = vunpack.c.l.bf16 %v4536_v62  ;;  %v4539_v61 = vunpack.c.l.bf16 %v4538_v32  ;;  %v4542_v36 = vld [vmem:[#allocation21_spill] sm:$0xff]  ;;  %v4544_v33 = vld [vmem:[#allocation24_spill] sm:$0xff]  ;;  %v4548_v19 = vld [vmem:[#allocation15_spill] sm:$0xff] }
 0x4b9   : > { %3108 = vmatprep.subr.bf16.mxu1 %v3002_v18  ;;  %1530 = vperm.xlu0 %3258, %v1508_v50   ;;  %v4540_v40 = vunpack.c.h.bf16 %v4536_v62  ;;  %v4541_v43 = vunpack.c.h.bf16 %v4538_v32  ;;  %v4543_v54 = vunpack.c.l.bf16 %v4542_v36  ;;  %v4545_v1 = vunpack.c.l.bf16 %v4544_v33  ;;  %v4550_v21 = vld [vmem:[#allocation14_spill] sm:$0xff] }
 0x4ba   : > { %1550 = vperm.xlu1 %3259, %v1512_v41   ;;  %v4546_v51 = vunpack.c.h.bf16 %v4542_v36  ;;  %v4547_v34 = vunpack.c.h.bf16 %v4544_v33  ;;  %v1492_v46 = vmul.f32 0.05, %v4548_v19  ;;  %v1495_v36 = vmul.f32 0.05, %v3674_v4 }
 0x4bb   : > { %3005 = vmatpush3.bf16.msra.mxu0 %v3002_v18 }
 0x4bc   : > { %3116 = vmatpush3.bf16.msra.mxu1 %v3002_v18  ;;  %3007 = vmatprep.subr.bf16.mxu0 %v3006_v16 }
 0x4bd   : > { %3109 = vmatprep.subr.bf16.mxu1 %v3006_v16  ;;  %1545 = vperm.xlu0 %3258, %v1511_v37   ;;  %v4549_v37 = vld [vmem:[#allocation17_spill] sm:$0xff] }
 0x4be   : > { %1560 = vperm.xlu1 %3259, %v1514_v57   ;;  %v1500_v57 = vmul.f32 0.05, %v4549_v37 }
 0x4bf   : > { %3009 = vmatpush3.bf16.msra.mxu0 %v3006_v16 }
 0x4c0   : > { %3117 = vmatpush3.bf16.msra.mxu1 %v3006_v16  ;;  %3011 = vmatprep.subr.bf16.mxu0 %v3010_v17 }
 0x4c1   : > { %3110 = vmatprep.subr.bf16.mxu1 %v3010_v17  ;;  %1555 = vperm.xlu0 %3258, %v1513_v52   ;;  %v1491_v52 = vmul.f32 0.05, %v4550_v21 }
 0x4c2   : > { %1570 = vperm.xlu1 %3259, %v1516_v12   ;;  %v1499_v12 = vmul.f32 0.05, %v3694_v8 }
 0x4c3   : > { %3013 = vmatpush3.bf16.msra.mxu0 %v3010_v17 }
 0x4c4   : > { %3118 = vmatpush3.bf16.msra.mxu1 %v3010_v17  ;;  %3015 = vmatprep.subr.bf16.mxu0 %v3014_v20 }
 0x4c5   : > { %3111 = vmatprep.subr.bf16.mxu1 %v3014_v20  ;;  %1565 = vperm.xlu0 %3258, %v1515_v58  }
 0x4c6   : > { %1580 = vperm.xlu1 %3259, %v1518_v35  }
 0x4c7   : > { %3017 = vmatpush3.bf16.msra.mxu0 %v3014_v20 }
 0x4c8   : > { %3119 = vmatpush3.bf16.msra.mxu1 %v3014_v20  ;;  %3019 = vmatprep.subr.bf16.mxu0 %v3018_v22 }
 0x4c9   : > { %3112 = vmatprep.subr.bf16.mxu1 %v3018_v22  ;;  %1575 = vperm.xlu0 %3258, %v1517_v9  }
 0x4ca   : > { %1590 = vperm.xlu1 %3259, %v1520_v59  }
 0x4cb   : > { %3021 = vmatpush3.bf16.msra.mxu0 %v3018_v22 }
 0x4cc   : > { %3120 = vmatpush3.bf16.msra.mxu1 %v3018_v22  ;;  %3023 = vmatprep.subr.bf16.mxu0 %v3022_v24 }
 0x4cd   : > { %3113 = vmatprep.subr.bf16.mxu1 %v3022_v24  ;;  %1585 = vperm.xlu0 %3258, %v1519_v27   ;;  %v1502_v27 = vmul.f32 0.05, %v3709_v11 }
 0x4ce   : > { %1600 = vperm.xlu1 %3259, %v1522_v47  }
 0x4cf   : > { %3025 = vmatpush3.bf16.msra.mxu0 %v3022_v24 }
 0x4d0   : > { %3121 = vmatpush3.bf16.msra.mxu1 %v3022_v24  ;;  %v1494_v24 = vmul.f32 0.05, %v3669_v3 }
 0x4d1   : > { %1595 = vperm.xlu0 %3258, %v1521_v26  }
 0x4d2   : > { %2763 = vmatmul.mubr.f32.vlgmr.msra.gmra.mrb[0].mxu0 %v4529_v29 }
 0x4d3   : > { %2775 = vmatmul.mubr.f32.vlgmr.msra.gmra.mrb[0].mxu1 %v4530_v49  ;;  %2765 = vmatprep.mubr.f32.mxu0 %v4531_v28  ;;  %v1493_v49 = vmul.f32 0.05, %v3664_v2  ;;  %v1501_v28 = vmul.f32 0.05, %v3704_v10  ;;  %v1496_v2 = vmul.f32 0.05, %v3679_v5 }
 0x4d4   : > { %2777 = vmatprep.mubr.f32.mxu1 %v4533_v63  ;;  %v1504_v10 = vmul.f32 0.05, %v3719_v13 }
 0x4d6   : > { %2766 = vmatmul.mubr.f32.gmra.mrb[2].mxu0 %v4534_v14 }
 0x4d7   : > { %2778 = vmatmul.mubr.f32.gmra.mrb[2].mxu1 %v4535_v30  ;;  %2768 = vmatprep.mubr.f32.mxu0 %v4537_v39 }
 0x4d8   : > { %2780 = vmatprep.mubr.f32.mxu1 %v4539_v61 }
 0x4da   : > { %2769 = vmatmul.mubr.f32.gmra.mrb[4].mxu0 %v4540_v40 }
 0x4db   : > { %2781 = vmatmul.mubr.f32.gmra.mrb[4].mxu1 %v4541_v43  ;;  %2771 = vmatprep.mubr.f32.mxu0 %v4543_v54  ;;  %v4551_v54 = vld [vmem:[#allocation18_spill] sm:$0xff] }
 0x4dc   : > { %2783 = vmatprep.mubr.f32.mxu1 %v4545_v1  ;;  %v1503_v33 = vmul.f32 0.05, %v4551_v54 }
 0x4de   : > { %2772 = vmatmul.mubr.f32.gmra.mrb[6].mxu0 %v4546_v51 }
 0x4df   : > { %2784 = vmatmul.mubr.f32.gmra.mrb[6].mxu1 %v4547_v34 }
 0x531   : > { %v1536_v6 = vpop.permute.xlu1 %1535 }
 0x534   : > { %v1526_v44 = vpop.permute.xlu0 %1525 }
 0x535   : > { %v1541_v48 = vpop.permute.xlu1 %1540 }
 0x538   : > { %v1531_v55 = vpop.permute.xlu0 %1530 }
 0x539   : > { %v1551_v60 = vpop.permute.xlu1 %1550 }
 0x53c   : > { %v1546_v0 = vpop.permute.xlu0 %1545 }
 0x53d   : > { %v4210_v18 = vpop.permute.xlu1 %1560 }
 0x540   : > { %v4212_v38 = vpop.permute.xlu0 %1555 }
 0x541   : > { %v1571_v56 = vpop.permute.xlu1 %1570 }
 0x544   : > { %v1566_v50 = vpop.permute.xlu0 %1565 }
 0x545   : > { %v1581_v41 = vpop.permute.xlu1 %1580 }
 0x548   : > { %v1576_v16 = vpop.permute.xlu0 %1575 }
 0x549   : > { %v1591_v42 = vpop.permute.xlu1 %1590 }
 0x54c   : > { %v1586_v25 = vpop.permute.xlu0 %1585 }
 0x5a5   : > { %v2764_v17 = vpop.f32.mrb[0].mxu0 }
 0x5a6   : > { %v2776_v45 = vpop.f32.mrb[0].mxu1  ;;  %v1604_v20 = vmul.f32 %v2764_v17, %v1531_v55  ;;  %v1412_v23 = vpop.f32.mrb[1].mxu0 }
 0x5a7   : > { %v1612_v53 = vmul.f32 %v2776_v45, %v1571_v56  ;;  %v1452_v58 = vpop.f32.mrb[1].mxu1  ;;  %v1603_v35 = vmul.f32 %v1526_v44, %v1412_v23  ;;  %v1601_v44 = vpop.permute.xlu1 %1600  ;;  %v1498_v56 = vmul.f32 0.05, %v3689_v7 }
 0x5a8   : > { %v1611_v22 = vmul.f32 %v1566_v50, %v1452_v58  ;;  %v4218_v9 = vadd.f32 %v1604_v20, %v1492_v46  ;;  %v1506_v50 = vmul.f32 0.05, %v3729_v15  ;;  %v4552_v46 = vld [vmem:[#allocation16_spill] sm:$0xff] }
 0x5a9   : > { %v4220_v59 = vadd.f32 %v1612_v53, %v1500_v57  ;;  %v4224_v47 = vadd.f32 %v1603_v35, %v1491_v52  ;;  %v2767_v8 = vpop.f32.mrb[2].mxu0  ;;  %v1497_v37 = vmul.f32 0.05, %v4552_v46  ;;  %v1658_v58 = vld [vmem:[#allocation7 + $0x10] sm:$0xff] (!%p2323_p12)  ;;  %v1671_v46 = vld [vmem:[#allocation7 + $0x78] sm:$0xff] (!%p2323_p12) }
 0x5aa   : > { %v4226_v26 = vadd.f32 %v1611_v22, %v1499_v12  ;;  %v2779_v29 = vpop.f32.mrb[2].mxu1  ;;  %1637 = vst [vmem:[#allocation2 + $0x8] sm:$0xff] %v4218_v9  ;;  %v1606_v31 = vmul.f32 %v2767_v8, %v1541_v48  ;;  %v1422_v14 = vpop.f32.mrb[3].mxu0  ;;  %v1659_v22 = vld [vmem:[#allocation7 + $0x18] sm:$0xff] (!%p2323_p12)  ;;  %v1662_v8 = vld [vmem:[#allocation7 + $0x30] sm:$0xff] (!%p2323_p12) }
 0x5ab   : > { %1645 = vst [vmem:[#allocation2 + $0x48] sm:$0xff] %v4220_v59  ;;  %v1614_v63 = vmul.f32 %v2779_v29, %v1581_v41  ;;  %v1462_v3 = vpop.f32.mrb[3].mxu1  ;;  %1636 = vst [vmem:[#allocation2] sm:$0xff] %v4224_v47  ;;  %v1605_v11 = vmul.f32 %v1536_v6, %v1422_v14  ;;  %v1596_v48 = vpop.permute.xlu0 %1595  ;;  %2818 = vmatprep.mubr.f32.mxu0 (!%p2323_p12), %v4224_v47  ;;  %v1840_v29 = vld [vmem:[#allocation9] sm:$0xff] (!%p2323_p12)  ;;  %v1843_v14 = vld [vmem:[#allocation9 + $0x18] sm:$0xff] (!%p2323_p12) }
 0x5ac   : > { %1644 = vst [vmem:[#allocation2 + $0x40] sm:$0xff] %v4226_v26  ;;  %v1613_v30 = vmul.f32 %v1576_v16, %v1462_v3  ;;  %v4234_v62 = vadd.f32 %v1606_v31, %v1494_v24  ;;  %v1661_v24 = vld [vmem:[#allocation7 + $0x28] sm:$0xff] (!%p2323_p12) }
 0x5ad   : > { %v4236_v39 = vadd.f32 %v1614_v63, %v1502_v27  ;;  %v4240_v32 = vadd.f32 %v1605_v11, %v1493_v49  ;;  %v2770_v40 = vpop.f32.mrb[4].mxu0  ;;  %v1841_v49 = vld [vmem:[#allocation9 + $0x8] sm:$0xff] (!%p2323_p12)  ;;  %v1842_v63 = vld [vmem:[#allocation9 + $0x10] sm:$0xff] (!%p2323_p12)  ;;  %v1844_v11 = vld [vmem:[#allocation9 + $0x20] sm:$0xff] (!%p2323_p12) }
 0x5ae   : > { %v4242_v61 = vadd.f32 %v1613_v30, %v1501_v28  ;;  %v2782_v43 = vpop.f32.mrb[4].mxu1  ;;  %1639 = vst [vmem:[#allocation2 + $0x18] sm:$0xff] %v4234_v62  ;;  %v1608_v1 = vmul.f32 %v2770_v40, %v1551_v60  ;;  %v1432_v34 = vpop.f32.mrb[5].mxu0  ;;  %v1663_v28 = vld [vmem:[#allocation7 + $0x38] sm:$0xff] (!%p2323_p12)  ;;  %v3058_v31 = vpack.c.bf16 (!%p2323_p12), %v1841_v49, %v1840_v29  ;;  %v3062_v3 = vpack.c.bf16 (!%p2323_p12), %v1843_v14, %v1842_v63  ;;  %v1845_v30 = vld [vmem:[#allocation9 + $0x28] sm:$0xff] (!%p2323_p12) }
 0x5af   : > { %1647 = vst [vmem:[#allocation2 + $0x58] sm:$0xff] %v4236_v39  ;;  %v1616_v51 = vmul.f32 %v2782_v43, %v1591_v42  ;;  %v1472_v5 = vpop.f32.mrb[5].mxu1  ;;  %1638 = vst [vmem:[#allocation2 + $0x10] sm:$0xff] %v4240_v32  ;;  %v1607_v13 = vmul.f32 %v1546_v0, %v1432_v34  ;;  %v4553_v0 = vld [vmem:[#allocation19_spill] sm:$0xff]  ;;  %v3030_v42 = vpack.c.bf16 (!%p2323_p12), %v1659_v22, %v1658_v58  ;;  %v1846_v43 = vld [vmem:[#allocation9 + $0x30] sm:$0xff] (!%p2323_p12) }
 0x5b0   : > { %1646 = vst [vmem:[#allocation2 + $0x50] sm:$0xff] %v4242_v61  ;;  %v1615_v6 = vmul.f32 %v1586_v25, %v1472_v5  ;;  %v4250_v55 = vadd.f32 %v1608_v1, %v1496_v2  ;;  %v1505_v57 = vmul.f32 0.05, %v4553_v0  ;;  %v1660_v25 = vld [vmem:[#allocation7 + $0x20] sm:$0xff] (!%p2323_p12)  ;;  %3059 = vmatprep.subr.bf16.mxu1 (!%p2323_p12), %v3058_v31  ;;  %v3038_v47 = vpack.c.bf16 (!%p2323_p12), %v1663_v28, %v1662_v8  ;;  %v1667_v1 = vld [vmem:[#allocation7 + $0x58] sm:$0xff] (!%p2323_p12)  ;;  %v1849_v5 = vld [vmem:[#allocation9 + $0x48] sm:$0xff] (!%p2323_p12) }
 0x5b1   : > { %v4252_v4 = vadd.f32 %v1616_v51, %v1504_v10  ;;  %v4256_v60 = vadd.f32 %v1607_v13, %v1495_v36  ;;  %v2773_v16 = vpop.f32.mrb[6].mxu0  ;;  %v3034_v27 = vpack.c.bf16 (!%p2323_p12), %v1661_v24, %v1660_v25  ;;  %3061 = vmatpush3.bf16.msra.mxu1 (!%p2323_p12), %v3058_v31  ;;  %v1664_v2 = vld [vmem:[#allocation7 + $0x40] sm:$0xff] (!%p2323_p12)  ;;  %v1665_v10 = vld [vmem:[#allocation7 + $0x48] sm:$0xff] (!%p2323_p12)  ;;  %v3066_v40 = vpack.c.bf16 (!%p2323_p12), %v1845_v30, %v1844_v11  ;;  %v1847_v36 = vld [vmem:[#allocation9 + $0x38] sm:$0xff] (!%p2323_p12) }
 0x5b2   : > { %v4258_v41 = vadd.f32 %v1615_v6, %v1503_v33  ;;  %v2785_v19 = vpop.f32.mrb[6].mxu1  ;;  %1641 = vst [vmem:[#allocation2 + $0x28] sm:$0xff] %v4250_v55  ;;  %v1610_v17 = vmul.f32 %v2773_v16, %v4210_v18  ;;  %v1442_v7 = vpop.f32.mrb[7].mxu0  ;;  %1655 = sbr.rel (%p2323_p12) target bundleno = 2275 (0x8e3), region = 80  ;;  %v1656_v18 = vld [vmem:[#allocation7] sm:$0xff] (!%p2323_p12)  ;;  %3063 = vmatprep.subr.bf16.mxu1 (!%p2323_p12), %v3062_v3  ;;  %v3042_v54 = vpack.c.bf16 (!%p2323_p12), %v1665_v10, %v1664_v2  ;;  %v1666_v33 = vld [vmem:[#allocation7 + $0x50] sm:$0xff] (!%p2323_p12) }
 0x5b3   : > { %1649 = vst [vmem:[#allocation2 + $0x68] sm:$0xff] %v4252_v4  ;;  %v1618_v45 = vmul.f32 %v2785_v19, %v1601_v44  ;;  %v1482_v21 = vpop.f32.mrb[7].mxu1  ;;  %1640 = vst [vmem:[#allocation2 + $0x20] sm:$0xff] %v4256_v60  ;;  %v1609_v15 = vmul.f32 %v4212_v38, %v1442_v7  ;;  %v1657_v38 = vld [vmem:[#allocation7 + $0x8] sm:$0xff] (!%p2323_p12)  ;;  %v3070_v51 = vpack.c.bf16 (!%p2323_p12), %v1847_v36, %v1846_v43  ;;  %v1848_v34 = vld [vmem:[#allocation9 + $0x40] sm:$0xff] (!%p2323_p12) }
 0x5b4   : > { %1648 = vst [vmem:[#allocation2 + $0x60] sm:$0xff] %v4258_v41  ;;  %v1617_v52 = vmul.f32 %v1596_v48, %v1482_v21  ;;  %v4268_v12 = vadd.f32 %v1610_v17, %v1498_v56  ;;  %v3026_v35 = vpack.c.bf16 (!%p2323_p12), %v1657_v38, %v1656_v18  ;;  %v3046_v13 = vpack.c.bf16 (!%p2323_p12), %v1667_v1, %v1666_v33  ;;  %v1668_v6 = vld [vmem:[#allocation7 + $0x60] sm:$0xff] (!%p2323_p12)  ;;  %v1669_v44 = vld [vmem:[#allocation7 + $0x68] sm:$0xff] (!%p2323_p12)  ;;  %v1850_v56 = vld [vmem:[#allocation9 + $0x50] sm:$0xff] (!%p2323_p12) }
 0x5b5   : > { %v4270_v20 = vadd.f32 %v1618_v45, %v1506_v50  ;;  %v4272_v53 = vadd.f32 %v1609_v15, %v1497_v37  ;;  %3065 = vmatpush3.bf16.msra.mxu1 (!%p2323_p12), %v3062_v3  ;;  %v3074_v48 = vpack.c.bf16 (!%p2323_p12), %v1849_v5, %v1848_v34  ;;  %v1851_v50 = vld [vmem:[#allocation9 + $0x58] sm:$0xff] (!%p2323_p12)  ;;  %v3050_v16 = vpack.c.bf16 (!%p2323_p12), %v1669_v44, %v1668_v6  ;;  %v1670_v19 = vld [vmem:[#allocation7 + $0x70] sm:$0xff] (!%p2323_p12)  ;;  %v1852_v0 = vld [vmem:[#allocation9 + $0x60] sm:$0xff] (!%p2323_p12) }
 0x5b6   : > { %v4274_v23 = vadd.f32 %v1617_v52, %v1505_v57  ;;  %1643 = vst [vmem:[#allocation2 + $0x38] sm:$0xff] %v4268_v12  ;;  %3027 = vmatprep.subr.bf16.mxu0 (!%p2323_p12), %v3026_v35  ;;  %3067 = vmatprep.subr.bf16.mxu1 (!%p2323_p12), %v3066_v40  ;;  %v3078_v37 = vpack.c.bf16 (!%p2323_p12), %v1851_v50, %v1850_v56  ;;  %v1853_v57 = vld [vmem:[#allocation9 + $0x68] sm:$0xff] (!%p2323_p12)  ;;  %v2008_v44 = vlaneseq (!%p2323_p12)  ;;  %v2325_v56 = vld [vmem:[%s4469_s6] ss:$0 sm:$0xff] (!%p2323_p12) }
 0x5b7   : > { %1651 = vst [vmem:[#allocation2 + $0x78] sm:$0xff] %v4270_v20  ;;  %1642 = vst [vmem:[#allocation2 + $0x30] sm:$0xff] %v4272_v53  ;;  %3029 = vmatpush3.bf16.msra.mxu0 (!%p2323_p12), %v3026_v35  ;;  %v3054_v17 = vpack.c.bf16 (!%p2323_p12), %v1671_v46, %v1670_v19  ;;  %v3082_v45 = vpack.c.bf16 (!%p2323_p12), %v1853_v57, %v1852_v0 }
 0x5b8   : > { %1650 = vst [vmem:[#allocation2 + $0x70] sm:$0xff] %v4274_v23  ;;  %3031 = vmatprep.subr.bf16.mxu0 (!%p2323_p12), %v3030_v42 }
 0x5b9   : > { %3069 = vmatpush3.bf16.msra.mxu1 %v3066_v40 }
 0x5ba   : > { %3071 = vmatprep.subr.bf16.mxu1 %v3070_v51 }
 0x5bb   : > { %3033 = vmatpush3.bf16.msra.mxu0 %v3030_v42 }
 0x5bc   : > { %3035 = vmatprep.subr.bf16.mxu0 %v3034_v27 }
 0x5bd   : > { %3073 = vmatpush3.bf16.msra.mxu1 %v3070_v51 }
 0x5be   : > { %3075 = vmatprep.subr.bf16.mxu1 %v3074_v48 }
 0x5bf   : > { %3037 = vmatpush3.bf16.msra.mxu0 %v3034_v27 }
 0x5c0   : > { %3039 = vmatprep.subr.bf16.mxu0 %v3038_v47 }
 0x5c1   : > { %3077 = vmatpush3.bf16.msra.mxu1 %v3074_v48  ;;  %v4300_v48 = vand.u32 127, %v2008_v44 }
 0x5c2   : > { %3079 = vmatprep.subr.bf16.mxu1 %v3078_v37 }
 0x5c3   : > { %3041 = vmatpush3.bf16.msra.mxu0 %v3038_v47  ;;  %vm2010_vm1 = vcmp.lt.s32.totalorder %v4300_v48, 4 }
 0x5c4   : > { %3043 = vmatprep.subr.bf16.mxu0 %v3042_v54 }
 0x5c5   : > { %3081 = vmatpush3.bf16.msra.mxu1 %v3078_v37 }
 0x5c6   : > { %3083 = vmatprep.subr.bf16.mxu1 %v3082_v45 }
 0x5c7   : > { %3045 = vmatpush3.bf16.msra.mxu0 %v3042_v54 }
 0x5c8   : > { %3047 = vmatprep.subr.bf16.mxu0 %v3046_v13 }
 0x5c9   : > { %3085 = vmatpush3.bf16.msra.mxu1 %v3082_v45 }
 0x5cb   : > { %3049 = vmatpush3.bf16.msra.mxu0 %v3046_v13 }
 0x5cc   : > { %3051 = vmatprep.subr.bf16.mxu0 %v3050_v16 }
 0x5cf   : > { %3053 = vmatpush3.bf16.msra.mxu0 %v3050_v16 }
 0x5d0   : > { %3055 = vmatprep.subr.bf16.mxu0 %v3054_v17 }
 0x5d3   : > { %3057 = vmatpush3.bf16.msra.mxu0 %v3054_v17 }
 0x5d6   : > { %2819 = vmatmul.mubr.f32.vlgmr.msra.gmra.mrb[0].mxu0 %v4218_v9  ;;  %v1854_v9 = vld [vmem:[#allocation9 + $0x70] sm:$0xff] }
 0x5d7   : > { %2821 = vmatprep.mubr.f32.mxu0 %v4240_v32 }
 0x5da   : > { %2822 = vmatmul.mubr.f32.gmra.mrb[2].mxu0 %v4234_v62  ;;  %v1855_v62 = vld [vmem:[#allocation9 + $0x78] sm:$0xff] }
 0x5db   : > { %2824 = vmatprep.mubr.f32.mxu0 %v4256_v60  ;;  %v3086_v32 = vpack.c.bf16 %v1855_v62, %v1854_v9 }
 0x5dd   : > { %3087 = vmatprep.subr.bf16.mxu1 %v3086_v32 }
 0x5de   : > { %2825 = vmatmul.mubr.f32.gmra.mrb[4].mxu0 %v4250_v55  ;;  %3089 = vmatpush3.bf16.msra.mxu1 %v3086_v32 }
 0x5df   : > { %2827 = vmatprep.mubr.f32.mxu0 %v4272_v53 }
 0x5e2   : > { %2828 = vmatmul.mubr.f32.gmra.mrb[6].mxu0 %v4268_v12 }
 0x5e3   : > { %2830 = vmatprep.mubr.f32.mxu0 %v4226_v26 }
 0x5e6   : > { %2831 = vmatmul.mubr.f32.gmra.mrb[8].mxu0 %v4220_v59  ;;  %v2324_v59 = vld [vmem:[%s4467_s4] ss:$0 sm:$0xff] }
 0x5e7   : > { %2833 = vmatprep.mubr.f32.mxu0 %v4242_v61 }
 0x5ea   : > { %2834 = vmatmul.mubr.f32.gmra.mrb[10].mxu0 %v4236_v39 }
 0x5eb   : > { %2836 = vmatprep.mubr.f32.mxu0 %v4258_v41 }
 0x5ee   : > { %2837 = vmatmul.mubr.f32.gmra.mrb[12].mxu0 %v4252_v4 }
 0x5ef   : > { %2839 = vmatprep.mubr.f32.mxu0 %v4274_v23 }
 0x5f2   : > { %2840 = vmatmul.mubr.f32.gmra.mrb[14].mxu0 %v4270_v20 }
 0x6a9   : > { %v2820_v26 = vpop.f32.mrb[0].mxu0 }
 0x6aa   : > { %v1751_v61 = vadd.f32 %v2820_v26, %v2324_v59  ;;  %v1745_v39 = vpop.f32.mrb[1].mxu0 }
 0x6ab   : > { %v1746_v55 = vadd.f32 %v2324_v59, %v1745_v39 }
 0x6ac   : > { %v1825_v4 = vmax.f32 %v1751_v61, 0.0 }
 0x6ad   : > { %v2823_v60 = vpop.f32.mrb[2].mxu0  ;;  %v1824_v41 = vmax.f32 %v1746_v55, 0.0 }
 0x6ae   : > { %v1761_v7 = vadd.f32 %v2823_v60, %v2324_v59  ;;  %v1755_v21 = vpop.f32.mrb[3].mxu0 }
 0x6af   : > { %v1756_v15 = vadd.f32 %v2324_v59, %v1755_v21  ;;  %2874 = vmatprep.mubr.f32.mxu1 %v1824_v41 }
 0x6b0   : > { %2875 = vmatmul.mubr.f32.vlgmr.msra.gmra.mrb[0].mxu1 %v1825_v4  ;;  %v1827_v20 = vmax.f32 %v1761_v7, 0.0 }
 0x6b1   : > { %v1826_v52 = vmax.f32 %v1756_v15, 0.0  ;;  %v2826_v12 = vpop.f32.mrb[4].mxu0 }
 0x6b2   : > { %v1771_v53 = vadd.f32 %v2826_v12, %v2324_v59  ;;  %v1765_v23 = vpop.f32.mrb[5].mxu0 }
 0x6b3   : > { %v1766_v18 = vadd.f32 %v2324_v59, %v1765_v23  ;;  %2877 = vmatprep.mubr.f32.mxu1 %v1826_v52 }
 0x6b4   : > { %v1829_v38 = vmax.f32 %v1771_v53, 0.0  ;;  %2878 = vmatmul.mubr.f32.gmra.mrb[2].mxu1 %v1827_v20 }
 0x6b5   : > { %v1828_v58 = vmax.f32 %v1766_v18, 0.0  ;;  %v2829_v35 = vpop.f32.mrb[6].mxu0 }
 0x6b6   : > { %v1781_v22 = vadd.f32 %v2829_v35, %v2324_v59  ;;  %v1775_v42 = vpop.f32.mrb[7].mxu0 }
 0x6b7   : > { %v1776_v25 = vadd.f32 %v2324_v59, %v1775_v42  ;;  %2880 = vmatprep.mubr.f32.mxu1 %v1828_v58 }
 0x6b8   : > { %v1831_v24 = vmax.f32 %v1781_v22, 0.0  ;;  %2881 = vmatmul.mubr.f32.gmra.mrb[4].mxu1 %v1829_v38 }
 0x6b9   : > { %v1830_v27 = vmax.f32 %v1776_v25, 0.0  ;;  %v2832_v8 = vpop.f32.mrb[8].mxu0 }
 0x6ba   : > { %v1791_v29 = vadd.f32 %v2832_v8, %v2324_v59  ;;  %v1785_v49 = vpop.f32.mrb[9].mxu0 }
 0x6bb   : > { %v1786_v28 = vadd.f32 %v2324_v59, %v1785_v49  ;;  %2883 = vmatprep.mubr.f32.mxu1 %v1830_v27 }
 0x6bc   : > { %v1833_v31 = vmax.f32 %v1791_v29, 0.0  ;;  %2884 = vmatmul.mubr.f32.gmra.mrb[6].mxu1 %v1831_v24 }
 0x6bd   : > { %v1832_v63 = vmax.f32 %v1786_v28, 0.0  ;;  %v2835_v14 = vpop.f32.mrb[10].mxu0 }
 0x6be   : > { %v1801_v3 = vadd.f32 %v2835_v14, %v2324_v59  ;;  %v1795_v11 = vpop.f32.mrb[11].mxu0 }
 0x6bf   : > { %v1796_v30 = vadd.f32 %v2324_v59, %v1795_v11  ;;  %2886 = vmatprep.mubr.f32.mxu1 %v1832_v63 }
 0x6c0   : > { %v1835_v47 = vmax.f32 %v1801_v3, 0.0  ;;  %2887 = vmatmul.mubr.f32.gmra.mrb[8].mxu1 %v1833_v31 }
 0x6c1   : > { %v1834_v2 = vmax.f32 %v1796_v30, 0.0  ;;  %v2838_v10 = vpop.f32.mrb[12].mxu0 }
 0x6c2   : > { %v1811_v40 = vadd.f32 %v2838_v10, %v2324_v59  ;;  %v1805_v43 = vpop.f32.mrb[13].mxu0 }
 0x6c3   : > { %v1806_v36 = vadd.f32 %v2324_v59, %v1805_v43  ;;  %2889 = vmatprep.mubr.f32.mxu1 %v1834_v2 }
 0x6c4   : > { %v1837_v54 = vmax.f32 %v1811_v40, 0.0  ;;  %2890 = vmatmul.mubr.f32.gmra.mrb[10].mxu1 %v1835_v47 }
 0x6c5   : > { %v1836_v33 = vmax.f32 %v1806_v36, 0.0  ;;  %v2841_v1 = vpop.f32.mrb[14].mxu0 }
 0x6c6   : > { %v1821_v51 = vadd.f32 %v2841_v1, %v2324_v59  ;;  %v1815_v34 = vpop.f32.mrb[15].mxu0 }
 0x6c7   : > { %v1816_v5 = vadd.f32 %v2324_v59, %v1815_v34  ;;  %2892 = vmatprep.mubr.f32.mxu1 %v1836_v33 }
 0x6c8   : > { %v1839_v13 = vmax.f32 %v1821_v51, 0.0  ;;  %2893 = vmatmul.mubr.f32.gmra.mrb[12].mxu1 %v1837_v54 }
 0x6c9   : > { %v1838_v6 = vmax.f32 %v1816_v5, 0.0 }
 0x6cb   : > { %2895 = vmatprep.mubr.f32.mxu1 %v1838_v6 }
 0x6cc   : > { %2896 = vmatmul.mubr.f32.gmra.mrb[14].mxu1 %v1839_v13 }
 0x783   : > { %v2876_v50 = vpop.f32.mrb[0].mxu1 }
 0x784   : > { %v1935_v16 = vadd.f32 %v2876_v50, %v2325_v56  ;;  %v1929_v19 = vpop.f32.mrb[1].mxu1 }
 0x785   : > { %v1930_v46 = vadd.f32 %v2325_v56, %v1929_v19 }
 0x786   : > { %v2012_v37 = vsel %vm2010_vm1, %v1935_v16, -1e+30 }
 0x787   : > { %2029 = vmax.xlane.f32.xlu0 %v2012_v37  ;;  %v2879_v0 = vpop.f32.mrb[2].mxu1  ;;  %v2011_v62 = vsel %vm2010_vm1, %v1930_v46, -1e+30 }
 0x788   : > { %v1945_v57 = vadd.f32 %v2879_v0, %v2325_v56  ;;  %v1939_v17 = vpop.f32.mrb[3].mxu1 }
 0x789   : > { %v1940_v45 = vadd.f32 %v2325_v56, %v1939_v17 }
 0x78a   : > { %v2014_v9 = vsel %vm2010_vm1, %v1945_v57, -1e+30 }
 0x78b   : > { %2033 = vmax.xlane.f32.xlu1 %v2014_v9  ;;  %v2882_v32 = vpop.f32.mrb[4].mxu1  ;;  %2027 = vmax.xlane.f32.xlu0 %v2011_v62  ;;  %v2013_v39 = vsel %vm2010_vm1, %v1940_v45, -1e+30 }
 0x78c   : > { %v1949_v59 = vpop.f32.mrb[5].mxu1  ;;  %v1955_v61 = vadd.f32 %v2882_v32, %v2325_v56 }
 0x78d   : > { %v1950_v26 = vadd.f32 %v2325_v56, %v1949_v59 }
 0x78e   : > { %v2016_v21 = vsel %vm2010_vm1, %v1955_v61, -1e+30 }
 0x78f   : > { %v2885_v55 = vpop.f32.mrb[6].mxu1  ;;  %2031 = vmax.xlane.f32.xlu1 %v2013_v39  ;;  %v2015_v60 = vsel %vm2010_vm1, %v1950_v26, -1e+30 }
 0x790   : > { %v1959_v41 = vpop.f32.mrb[7].mxu1  ;;  %2035 = vmax.xlane.f32.xlu0 %v2015_v60  ;;  %v1965_v7 = vadd.f32 %v2885_v55, %v2325_v56 }
 0x791   : > { %v1960_v4 = vadd.f32 %v2325_v56, %v1959_v41 }
 0x792   : > { %v2018_v23 = vsel %vm2010_vm1, %v1965_v7, -1e+30 }
 0x793   : > { %v2888_v15 = vpop.f32.mrb[8].mxu1  ;;  %2037 = vmax.xlane.f32.xlu1 %v2016_v21  ;;  %v2017_v52 = vsel %vm2010_vm1, %v1960_v4, -1e+30 }
 0x794   : > { %v1969_v12 = vpop.f32.mrb[9].mxu1  ;;  %2039 = vmax.xlane.f32.xlu0 %v2017_v52  ;;  %v1975_v53 = vadd.f32 %v2888_v15, %v2325_v56 }
 0x795   : > { %v1970_v20 = vadd.f32 %v2325_v56, %v1969_v12 }
 0x796   : > { %v2020_v42 = vsel %vm2010_vm1, %v1975_v53, -1e+30 }
 0x797   : > { %v2891_v18 = vpop.f32.mrb[10].mxu1  ;;  %2041 = vmax.xlane.f32.xlu1 %v2018_v23  ;;  %v2019_v38 = vsel %vm2010_vm1, %v1970_v20, -1e+30 }
 0x798   : > { %v1979_v58 = vpop.f32.mrb[11].mxu1  ;;  %2043 = vmax.xlane.f32.xlu0 %v2019_v38  ;;  %v1985_v22 = vadd.f32 %v2891_v18, %v2325_v56 }
 0x799   : > { %v1980_v35 = vadd.f32 %v2325_v56, %v1979_v58 }
 0x79a   : > { %v4333_v49 = vsel %vm2010_vm1, %v1985_v22, -1e+30 }
 0x79b   : > { %v2894_v25 = vpop.f32.mrb[12].mxu1  ;;  %2045 = vmax.xlane.f32.xlu1 %v2020_v42  ;;  %v4328_v24 = vsel %vm2010_vm1, %v1980_v35, -1e+30 }
 0x79c   : > { %v1989_v27 = vpop.f32.mrb[13].mxu1  ;;  %2047 = vmax.xlane.f32.xlu0 %v4328_v24  ;;  %v1995_v29 = vadd.f32 %v2894_v25, %v2325_v56 }
 0x79d   : > { %v1990_v8 = vadd.f32 %v2325_v56, %v1989_v27 }
 0x79e   : > { %v4343_v11 = vsel %vm2010_vm1, %v1995_v29, -1e+30 }
 0x79f   : > { %v2897_v28 = vpop.f32.mrb[14].mxu1  ;;  %2049 = vmax.xlane.f32.xlu1 %v4333_v49  ;;  %v4338_v31 = vsel %vm2010_vm1, %v1990_v8, -1e+30 }
 0x7a0   : > { %v1999_v63 = vpop.f32.mrb[15].mxu1  ;;  %2051 = vmax.xlane.f32.xlu0 %v4338_v31  ;;  %v2005_v3 = vadd.f32 %v2897_v28, %v2325_v56 }
 0x7a1   : > { %v2000_v14 = vadd.f32 %v2325_v56, %v1999_v63 }
 0x7a2   : > { %v4353_v47 = vsel %vm2010_vm1, %v2005_v3, -1e+30 }
 0x7a3   : > { %2053 = vmax.xlane.f32.xlu1 %v4343_v11  ;;  %v4348_v30 = vsel %vm2010_vm1, %v2000_v14, -1e+30 }
 0x7a4   : > { %2055 = vmax.xlane.f32.xlu0 %v4348_v30 }
 0x7a7   : > { %2057 = vmax.xlane.f32.xlu1 %v4353_v47 }
 0x814   : > { %v2030_v2 = vpop.xlane.xlu0 %2029 }
 0x815   : > { %v4356_v10 = vsub.f32 %v2012_v37, %v2030_v2 }
 0x817   : > { %v2077_v40 = vmul.f32 1.442695, %v4356_v10 }
 0x818   : > { %v2034_v43 = vpop.xlane.xlu1 %2033  ;;  %v2028_v36 = vpop.xlane.xlu0 %2027 }
 0x819   : > { %3260 = vpow2.f32 %v2077_v40  ;;  %v4359_v54 = vsub.f32 %v2014_v9, %v2034_v43  ;;  %v4361_v33 = vsub.f32 %v2011_v62, %v2028_v36 }
 0x81b   : > { %v2081_v1 = vmul.f32 1.442695, %v4359_v54  ;;  %v2075_v51 = vmul.f32 1.442695, %v4361_v33 }
 0x81c   : > { %v2032_v34 = vpop.xlane.xlu1 %2031 }
 0x81d   : > { %3262 = vpow2.f32 %v2081_v1  ;;  %v4365_v5 = vsub.f32 %v2013_v39, %v2032_v34  ;;  %v2036_v13 = vpop.xlane.xlu0 %2035 }
 0x81e   : > { %3264 = vpow2.f32 %v2075_v51  ;;  %v4367_v6 = vsub.f32 %v2015_v60, %v2036_v13 }
 0x81f   : > { %v2079_v44 = vmul.f32 1.442695, %v4365_v5 }
 0x820   : > { %v2038_v48 = vpop.xlane.xlu1 %2037  ;;  %v2083_v16 = vmul.f32 1.442695, %v4367_v6 }
 0x821   : > { %3266 = vpow2.f32 %v2079_v44  ;;  %v4370_v56 = vsub.f32 %v2016_v21, %v2038_v48  ;;  %v2040_v50 = vpop.xlane.xlu0 %2039 }
 0x822   : > { %v4373_v19 = vsub.f32 %v2017_v52, %v2040_v50 }
 0x823   : > { %v3261_v46 = vpop.eup %3260  ;;  %v2085_v37 = vmul.f32 1.442695, %v4370_v56 }
 0x824   : > { %2109 = vadd.xlane.f32.xlu1 %v3261_v46  ;;  %v2042_v0 = vpop.xlane.xlu1 %2041  ;;  %v2087_v45 = vmul.f32 1.442695, %v4373_v19 }
 0x825   : > { %3268 = vpow2.f32 %v2085_v37  ;;  %v4376_v57 = vsub.f32 %v2018_v23, %v2042_v0  ;;  %v2044_v17 = vpop.xlane.xlu0 %2043 }
 0x826   : > { %3270 = vpow2.f32 %v2083_v16  ;;  %v4379_v9 = vsub.f32 %v2019_v38, %v2044_v17 }
 0x827   : > { %v3263_v62 = vpop.eup %3262  ;;  %v2089_v32 = vmul.f32 1.442695, %v4376_v57 }
 0x828   : > { %v3265_v59 = vpop.eup %3264  ;;  %2113 = vadd.xlane.f32.xlu1 %v3263_v62  ;;  %v2046_v26 = vpop.xlane.xlu1 %2045  ;;  %v2091_v55 = vmul.f32 1.442695, %v4379_v9 }
 0x829   : > { %3272 = vpow2.f32 %v2089_v32  ;;  %v4382_v61 = vsub.f32 %v2020_v42, %v2046_v26  ;;  %2107 = vadd.xlane.f32.xlu0 %v3265_v59  ;;  %v2048_v39 = vpop.xlane.xlu0 %2047 }
 0x82a   : > { %3274 = vpow2.f32 %v2087_v45  ;;  %v4386_v60 = vsub.f32 %v4328_v24, %v2048_v39 }
 0x82b   : > { %v3267_v41 = vpop.eup %3266  ;;  %v2093_v4 = vmul.f32 1.442695, %v4382_v61 }
 0x82c   : > { %v2050_v7 = vpop.xlane.xlu1 %2049  ;;  %v2095_v52 = vmul.f32 1.442695, %v4386_v60 }
 0x82d   : > { %3276 = vpow2.f32 %v2093_v4  ;;  %v4390_v21 = vsub.f32 %v4333_v49, %v2050_v7  ;;  %2111 = vadd.xlane.f32.xlu0 %v3267_v41  ;;  %v2052_v15 = vpop.xlane.xlu0 %2051 }
 0x82e   : > { %3278 = vpow2.f32 %v2091_v55  ;;  %v4394_v12 = vsub.f32 %v4338_v31, %v2052_v15 }
 0x82f   : > { %v3269_v20 = vpop.eup %3268  ;;  %v2097_v53 = vmul.f32 1.442695, %v4390_v21 }
 0x830   : > { %v3271_v23 = vpop.eup %3270  ;;  %2117 = vadd.xlane.f32.xlu1 %v3269_v20  ;;  %v2054_v18 = vpop.xlane.xlu1 %2053  ;;  %v2099_v35 = vmul.f32 1.442695, %v4394_v12 }
 0x831   : > { %3280 = vpow2.f32 %v2097_v53  ;;  %v4398_v38 = vsub.f32 %v4343_v11, %v2054_v18  ;;  %2115 = vadd.xlane.f32.xlu0 %v3271_v23  ;;  %v2056_v58 = vpop.xlane.xlu0 %2055 }
 0x832   : > { %3282 = vpow2.f32 %v2095_v52  ;;  %v4402_v22 = vsub.f32 %v4348_v30, %v2056_v58 }
 0x833   : > { %v3273_v42 = vpop.eup %3272  ;;  %v2101_v25 = vmul.f32 1.442695, %v4398_v38 }
 0x834   : > { %v3275_v24 = vpop.eup %3274  ;;  %2121 = vadd.xlane.f32.xlu1 %v3273_v42  ;;  %v2058_v27 = vpop.xlane.xlu1 %2057  ;;  %v2103_v29 = vmul.f32 1.442695, %v4402_v22 }
 0x835   : > { %3284 = vpow2.f32 %v2101_v25  ;;  %v4406_v8 = vsub.f32 %v4353_v47, %v2058_v27  ;;  %2119 = vadd.xlane.f32.xlu0 %v3275_v24 }
 0x836   : > { %3286 = vpow2.f32 %v2099_v35 }
 0x837   : > { %v3277_v49 = vpop.eup %3276  ;;  %v2105_v28 = vmul.f32 1.442695, %v4406_v8 }
 0x838   : > { %v3279_v31 = vpop.eup %3278  ;;  %2125 = vadd.xlane.f32.xlu1 %v3277_v49 }
 0x839   : > { %3288 = vpow2.f32 %v2105_v28  ;;  %2123 = vadd.xlane.f32.xlu0 %v3279_v31 }
 0x83a   : > { %3290 = vpow2.f32 %v2103_v29 }
 0x83b   : > { %v3281_v63 = vpop.eup %3280 }
 0x83c   : > { %v3283_v14 = vpop.eup %3282  ;;  %2129 = vadd.xlane.f32.xlu1 %v3281_v63 }
 0x83d   : > { %2127 = vadd.xlane.f32.xlu0 %v3283_v14 }
 0x83f   : > { %v3285_v3 = vpop.eup %3284 }
 0x840   : > { %v3287_v11 = vpop.eup %3286  ;;  %2133 = vadd.xlane.f32.xlu1 %v3285_v3 }
 0x841   : > { %2131 = vadd.xlane.f32.xlu0 %v3287_v11 }
 0x843   : > { %v3289_v30 = vpop.eup %3288 }
 0x844   : > { %v3291_v47 = vpop.eup %3290  ;;  %2137 = vadd.xlane.f32.xlu1 %v3289_v30 }
 0x845   : > { %2135 = vadd.xlane.f32.xlu0 %v3291_v47 }
 0x8b1   : > { %v2110_v2 = vpop.xlane.xlu1 %2109 }
 0x8b2   : > { %3292 = vlog2.f32 %v2110_v2 }
 0x8b5   : > { %v2114_v40 = vpop.xlane.xlu1 %2113 }
 0x8b6   : > { %3294 = vlog2.f32 %v2114_v40  ;;  %v2108_v43 = vpop.xlane.xlu0 %2107 }
 0x8b7   : > { %3296 = vlog2.f32 %v2108_v43 }
 0x8ba   : > { %v2112_v36 = vpop.xlane.xlu0 %2111 }
 0x8bb   : > { %3298 = vlog2.f32 %v2112_v36 }
 0x8bc   : > { %v3293_v1 = vpop.eup %3292 }
 0x8bd   : > { %v2142_v51 = vmul.f32 0.6931472, %v3293_v1  ;;  %v2118_v34 = vpop.xlane.xlu1 %2117 }
 0x8be   : > { %3300 = vlog2.f32 %v2118_v34  ;;  %v2116_v13 = vpop.xlane.xlu0 %2115 }
 0x8bf   : > { %v2172_v44 = vsub.f32 %v4356_v10, %v2142_v51  ;;  %3302 = vlog2.f32 %v2116_v13 }
 0x8c0   : > { %v3295_v48 = vpop.eup %3294 }
 0x8c1   : > { %v3297_v50 = vpop.eup %3296  ;;  %2189 = vst [vmem:[#allocation10 + $0x8] sm:$0xff] %v2172_v44  ;;  %v2146_v16 = vmul.f32 0.6931472, %v3295_v48  ;;  %v2122_v46 = vpop.xlane.xlu1 %2121 }
 0x8c2   : > { %v2140_v37 = vmul.f32 0.6931472, %v3297_v50  ;;  %3304 = vlog2.f32 %v2122_v46  ;;  %v2120_v0 = vpop.xlane.xlu0 %2119 }
 0x8c3   : > { %v2174_v17 = vsub.f32 %v4359_v54, %v2146_v16  ;;  %3306 = vlog2.f32 %v2120_v0 }
 0x8c4   : > { %v2171_v45 = vsub.f32 %v4361_v33, %v2140_v37 }
 0x8c5   : > { %v3299_v62 = vpop.eup %3298  ;;  %2191 = vst [vmem:[#allocation10 + $0x18] sm:$0xff] %v2174_v17  ;;  %v2126_v32 = vpop.xlane.xlu1 %2125 }
 0x8c6   : > { %2188 = vst [vmem:[#allocation10] sm:$0xff] %v2171_v45  ;;  %v2144_v59 = vmul.f32 0.6931472, %v3299_v62  ;;  %3308 = vlog2.f32 %v2126_v32  ;;  %v2124_v10 = vpop.xlane.xlu0 %2123 }
 0x8c7   : > { %3310 = vlog2.f32 %v2124_v10 }
 0x8c8   : > { %v3301_v26 = vpop.eup %3300  ;;  %v2173_v39 = vsub.f32 %v4365_v5, %v2144_v59 }
 0x8c9   : > { %v3303_v55 = vpop.eup %3302  ;;  %v2150_v41 = vmul.f32 0.6931472, %v3301_v26  ;;  %v2130_v4 = vpop.xlane.xlu1 %2129 }
 0x8ca   : > { %2190 = vst [vmem:[#allocation10 + $0x10] sm:$0xff] %v2173_v39  ;;  %v2148_v7 = vmul.f32 0.6931472, %v3303_v55  ;;  %3312 = vlog2.f32 %v2130_v4  ;;  %v2128_v54 = vpop.xlane.xlu0 %2127 }
 0x8cb   : > { %v2176_v33 = vsub.f32 %v4370_v56, %v2150_v41  ;;  %3314 = vlog2.f32 %v2128_v54 }
 0x8cc   : > { %v3305_v15 = vpop.eup %3304  ;;  %v2175_v52 = vsub.f32 %v4367_v6, %v2148_v7 }
 0x8cd   : > { %v3307_v20 = vpop.eup %3306  ;;  %2193 = vst [vmem:[#allocation10 + $0x28] sm:$0xff] %v2176_v33  ;;  %v2154_v53 = vmul.f32 0.6931472, %v3305_v15  ;;  %v2134_v23 = vpop.xlane.xlu1 %2133 }
 0x8ce   : > { %2192 = vst [vmem:[#allocation10 + $0x20] sm:$0xff] %v2175_v52  ;;  %v2152_v18 = vmul.f32 0.6931472, %v3307_v20  ;;  %3316 = vlog2.f32 %v2134_v23  ;;  %v2132_v5 = vpop.xlane.xlu0 %2131 }
 0x8cf   : > { %v2178_v58 = vsub.f32 %v4376_v57, %v2154_v53  ;;  %3318 = vlog2.f32 %v2132_v5 }
 0x8d0   : > { %v3309_v35 = vpop.eup %3308  ;;  %v2177_v42 = vsub.f32 %v4373_v19, %v2152_v18 }
 0x8d1   : > { %v3311_v25 = vpop.eup %3310  ;;  %2195 = vst [vmem:[#allocation10 + $0x38] sm:$0xff] %v2178_v58  ;;  %v2158_v56 = vmul.f32 0.6931472, %v3309_v35  ;;  %v2138_v24 = vpop.xlane.xlu1 %2137 }
 0x8d2   : > { %2194 = vst [vmem:[#allocation10 + $0x30] sm:$0xff] %v2177_v42  ;;  %v2156_v6 = vmul.f32 0.6931472, %v3311_v25  ;;  %3320 = vlog2.f32 %v2138_v24  ;;  %v2136_v27 = vpop.xlane.xlu0 %2135 }
 0x8d3   : > { %v2180_v29 = vsub.f32 %v4382_v61, %v2158_v56  ;;  %3322 = vlog2.f32 %v2136_v27 }
 0x8d4   : > { %v3313_v49 = vpop.eup %3312  ;;  %v2179_v28 = vsub.f32 %v4379_v9, %v2156_v6 }
 0x8d5   : > { %v3315_v31 = vpop.eup %3314  ;;  %2197 = vst [vmem:[#allocation10 + $0x48] sm:$0xff] %v2180_v29  ;;  %v2162_v57 = vmul.f32 0.6931472, %v3313_v49 }
 0x8d6   : > { %2196 = vst [vmem:[#allocation10 + $0x40] sm:$0xff] %v2179_v28  ;;  %v2160_v63 = vmul.f32 0.6931472, %v3315_v31 }
 0x8d7   : > { %v2182_v19 = vsub.f32 %v4390_v21, %v2162_v57 }
 0x8d8   : > { %v3317_v14 = vpop.eup %3316  ;;  %v2181_v3 = vsub.f32 %v4386_v60, %v2160_v63 }
 0x8d9   : > { %v3319_v11 = vpop.eup %3318  ;;  %2199 = vst [vmem:[#allocation10 + $0x58] sm:$0xff] %v2182_v19  ;;  %v2166_v30 = vmul.f32 0.6931472, %v3317_v14 }
 0x8da   : > { %2198 = vst [vmem:[#allocation10 + $0x50] sm:$0xff] %v2181_v3  ;;  %v2164_v47 = vmul.f32 0.6931472, %v3319_v11 }
 0x8db   : > { %v2184_v61 = vsub.f32 %v4398_v38, %v2166_v30 }
 0x8dc   : > { %v3321_v2 = vpop.eup %3320  ;;  %v2183_v9 = vsub.f32 %v4394_v12, %v2164_v47 }
 0x8dd   : > { %v3323_v40 = vpop.eup %3322  ;;  %2201 = vst [vmem:[#allocation10 + $0x68] sm:$0xff] %v2184_v61  ;;  %v2170_v43 = vmul.f32 0.6931472, %v3321_v2 }
 0x8de   : > { %2200 = vst [vmem:[#allocation10 + $0x60] sm:$0xff] %v2183_v9  ;;  %v2168_v36 = vmul.f32 0.6931472, %v3323_v40 }
 0x8df   : > { %v2186_v21 = vsub.f32 %v4406_v8, %v2170_v43 }
 0x8e0   : > { %v2185_v1 = vsub.f32 %v4402_v22, %v2168_v36 }
 0x8e1   : > { %2203 = vst [vmem:[#allocation10 + $0x78] sm:$0xff] %v2186_v21 }
 0x8e2   : > { %2202 = vst [vmem:[#allocation10 + $0x70] sm:$0xff] %v2185_v1 }
 0x8e3 PF: > { %s4554_s17 = sadd.s32 4294967295, %s3468_s26   ;;  %s3479_s20 = smov [#allocation10]  }
 0x8e4   : > { %p4428_p13 = scmp.eq.s32.totalorder %s4554_s17, 9  ;;  %s2210_s21 = sshll.u32 %s3479_s20, 4  ;;  %s2211_s21 = int_to_ptr.vmem [resolvable:$true] %s2210_s21 }
 0x8e5   : > { %s3408_s22 = scalar_lea.vmem %s2211_s21, 2048  ;;  %p3415_p4 = scmp.lt.s32.totalorder %s2211_s21, %s2211_s21 }
 0x8e6   : > { %p3409_p6 = scmp.ne.s32.totalorder %s2211_s21, %s3408_s22  ;;  %p3416_p7 = scmp.lt.s32.totalorder %s3408_s22, %s3408_s22 }
 0x8e8   : > { %p3410_p0 = pnand %p3409_p6, %p4428_p13  ;;  %p3417_p9 = por %p3416_p7, %p3415_p4 }
 0x8ea   : > { %p3411_p1 = pneg %p3410_p0 }
 0x8ec   : > { %p3418_p3 = pnand %p3417_p9, %p3411_p1 }
 0x8ee   : > { %3421 = shalt.err (!%p3418_p3)
}
 0x8ef   : > { %s3422_s11 = scalar_lea.hbm %s4470_s7, 2048 }
 0x8f0   : > { %p3423_p8 = scmp.ne.s32.totalorder %s4470_s7, %s3422_s11  ;;  %p3428_p10 = scmp.lt.u32.totalorder %s3422_s11, %s4470_s7 }
 0x8f2   : > { %p3424_p2 = pnand %p3423_p8, %p4428_p13 }
 0x8f4   : > { %p3425_p5 = pneg %p3424_p2 }
 0x8f6   : > { %p3430_p11 = pnand %p3428_p10, %p3425_p5 }
 0x8f8   : > { %3433 = shalt.err (!%p3430_p11)
}
 0x8f9   : > { %s3480_s8 = smov 128   ;;  %s3481_s27 = smov 8  }
 0x8fa   : > { %3135 = dma.vmem_to_hbm [thread:$0]  (%p4428_p13), %s2211_s21, 2048, %s4470_s7, [#allocation6], %s3480_s8, %s3480_s8, %s3481_s27  }
 0x8fb   : > { %3455 = dma.done.wait (%p4428_p13), [#allocation6], 2048  }
 0x8fc   : > { %3457 = vsyncadd (%p4428_p13), [#allocation6], 4294965248 }
 0x8fd PF: > { %s20_s26 = sadd.s32 1, %s3468_s26   ;;  %s4556_s24 = smov %s3464_s25 }
 0x8fe   : > { %p17_p12 = scmp.ge.s32.totalorder %s20_s26, 12   ;;  %s4557_s25 = smov %s4559_s10 }
 0x900   :  { %19 = sbr.rel (!%p17_p12) target bundleno = 4 (0x4), region = 114 }
 0x907   :  { %2226 = vsyncpa [#allocation5], 1 }
 0x908   :  { %2228 = vsyncpa [#allocation5 + $0x1], 1 }
 0x909   :  { %2229 = vsyncpa [#allocation8], 1 }
 0x90a   :  { %2230 = vsyncpa [#allocation6], 1 }
 0x90b   :  { %2232 = vsyncpa [#allocation6 + $0x1], 1 }

</bundles_post_ra>
